<compile_context>
chip_gen: v7x
topology: tpu7x:2x2x1
jax: 0.10.0
libtpu: 0.0.40
codegen_flags: <defaults>
</compile_context>

<pallas_src>
import math
import functools

import numpy as np
import jax
import jax.numpy as jnp
from jax.experimental import pallas as pl
from jax.experimental.pallas import tpu as pltpu

LN_EPS = 1e-5  # torch.nn.LayerNorm default


def _layer_norm(x, gamma, beta):
    mu = jnp.mean(x, axis=-1, keepdims=True)
    var = jnp.mean((x - mu) ** 2, axis=-1, keepdims=True)
    return (x - mu) * jax.lax.rsqrt(var + LN_EPS) * gamma + beta


def fused_encoder_kernel(x_ref,
                         wq_ref, bq_ref, wk_ref, bk_ref, wv_ref, bv_ref,
                         wo_ref, bo_ref,
                         ln1_g_ref, ln1_b_ref,
                         w1_ref, b1_ref, w2_ref, b2_ref,
                         ln2_g_ref, ln2_b_ref,
                         o_ref, carry_ref,
                         *, num_heads, d_k):
    """grid = (batch, layer).  One grid step = one full encoder layer for one
    batch element.  carry_ref (VMEM scratch) holds the running activation
    across the sequential layer axis."""
    S, D = carry_ref.shape
    layer = pl.program_id(1)

    # Load the encoder input only at the first layer; afterwards the carry
    # scratch already holds layer (l-1)'s output for this batch element.
    @pl.when(layer == 0)
    def _():
        carry_ref[...] = x_ref[...].astype(jnp.float32)

    x = carry_ref[...]                                   # (S, D) f32
    res = x
    xb = x.astype(jnp.bfloat16)

    # ---- multi-head self-attention (dropout = identity in eval mode) ----
    def proj(w_ref, b_ref):
        return (jnp.dot(xb, w_ref[...], preferred_element_type=jnp.float32)
                + b_ref[...])                            # (S, D) f32

    q = proj(wq_ref, bq_ref)
    k = proj(wk_ref, bk_ref)
    v = proj(wv_ref, bv_ref)

    def split_heads(t):                                  # (S, D) -> (H, S, d_k)
        return jnp.swapaxes(t.reshape(S, num_heads, d_k), 0, 1)

    qh = split_heads(q).astype(jnp.bfloat16)
    kh = split_heads(k).astype(jnp.bfloat16)
    vh = split_heads(v).astype(jnp.bfloat16)

    # Batched over heads: MXU contraction width d_k, output width S.
    scores = jnp.einsum("hqd,hkd->hqk", qh, kh,
                        preferred_element_type=jnp.float32)  # (H, S, S) f32
    scores = scores * (1.0 / math.sqrt(d_k))
    # TODO(synk): mask / masked_fill path not wired (mask=None in this config).
    scores = scores - jnp.max(scores, axis=-1, keepdims=True)
    p = jnp.exp(scores)
    p = p * pl.reciprocal(jnp.sum(p, axis=-1, keepdims=True), approx=True)

    ctx = jnp.einsum("hqk,hkd->hqd", p.astype(jnp.bfloat16), vh,
                     preferred_element_type=jnp.float32)     # (H, S, d_k) f32
    ctx = jnp.swapaxes(ctx, 0, 1).reshape(S, D)              # (S, D)

    attn = (jnp.dot(ctx.astype(jnp.bfloat16), wo_ref[...],
                    preferred_element_type=jnp.float32) + bo_ref[...])

    x = _layer_norm(res + attn, ln1_g_ref[...], ln1_b_ref[...])

    # ---- position-wise feed-forward ----
    res = x
    xb = x.astype(jnp.bfloat16)
    hdn = (jnp.dot(xb, w1_ref[...], preferred_element_type=jnp.float32)
           + b1_ref[...])
    hdn = jnp.maximum(hdn, 0.0).astype(jnp.bfloat16)
    ffn = (jnp.dot(hdn, w2_ref[...], preferred_element_type=jnp.float32)
           + b2_ref[...])
    x = _layer_norm(res + ffn, ln2_g_ref[...], ln2_b_ref[...])

    # Carry to the next layer and write this layer's output block (b, l).
    carry_ref[...] = x
    o_ref[...] = x.astype(o_ref.dtype)


def transformer_encoder_forward(x, layer_params, num_heads):
    """Matches TransformerEncoder.forward with mask=None, mem=None, pre_ln=False."""
    B, S, D = x.shape
    L = len(layer_params)
    d_k = D // num_heads

    def stack(name, dtype=None):
        a = jnp.stack([p[name] for p in layer_params], axis=0)
        return a.astype(dtype) if dtype is not None else a

    # Matmul weights in bf16 (MXU operands); biases / LN params stay f32.
    weights = (
        stack("wq", jnp.bfloat16), stack("bq"),
        stack("wk", jnp.bfloat16), stack("bk"),
        stack("wv", jnp.bfloat16), stack("bv"),
        stack("wo", jnp.bfloat16), stack("bo"),
        stack("ln1_g"), stack("ln1_b"),
        stack("w1", jnp.bfloat16), stack("b1"),
        stack("w2", jnp.bfloat16), stack("b2"),
        stack("ln2_g"), stack("ln2_b"),
    )

    def w_spec(arr):
        # Stacked (L, ...) -> one layer's tensor per grid step (prefetched
        # for layer l+1 while layer l runs, courtesy of double-buffering).
        return pl.BlockSpec((None,) + arr.shape[1:], lambda b, l: (l, 0, 0))

    in_specs = [pl.BlockSpec((None, S, D), lambda b, l: (b, 0, 0))]
    in_specs += [w_spec(a) for a in weights]

    kernel = functools.partial(fused_encoder_kernel,
                               num_heads=num_heads, d_k=d_k)

    encoded = pl.pallas_call(
        kernel,
        out_shape=jax.ShapeDtypeStruct((B, L, S, D), x.dtype),
        grid=(B, L),
        in_specs=in_specs,
        out_specs=pl.BlockSpec((None, None, S, D), lambda b, l: (b, l, 0, 0)),
        scratch_shapes=[pltpu.VMEM((S, D), jnp.float32)],
        compiler_params=pltpu.CompilerParams(
            # layer axis is a sequential carry -> "arbitrary"; batch is parallel
            # (megacore sharding on v7x).
            dimension_semantics=("parallel", "arbitrary")),
    )(x, *weights)

    # pre_ln=False: the encoder output equals the last layer's output.
    return encoded[:, -1], encoded


# ---------------- deterministic parameter init ----------------
def init_layer_params(key, d_model, d_ff):
    ks = jax.random.split(key, 12)
    s = 0.02

    def w(k, shp):
        return jax.random.normal(k, shp, jnp.float32) * s

    return {
        "wq": w(ks[0], (d_model, d_model)), "bq": w(ks[1], (1, d_model)),
        "wk": w(ks[2], (d_model, d_model)), "bk": w(ks[3], (1, d_model)),
        "wv": w(ks[4], (d_model, d_model)), "bv": w(ks[5], (1, d_model)),
        "wo": w(ks[6], (d_model, d_model)), "bo": w(ks[7], (1, d_model)),
        "ln1_g": jnp.ones((1, d_model), jnp.float32),
        "ln1_b": jnp.zeros((1, d_model), jnp.float32),
        "w1": w(ks[8], (d_model, d_ff)), "b1": w(ks[9], (1, d_ff)),
        "w2": w(ks[10], (d_ff, d_model)), "b2": w(ks[11], (1, d_model)),
        "ln2_g": jnp.ones((1, d_model), jnp.float32),
        "ln2_b": jnp.zeros((1, d_model), jnp.float32),
    }


# ---------------- pure-JAX f32 reference for verification ----------------
def _ref_layer(x, p, num_heads):
    B, S, D = x.shape
    d_k = D // num_heads
    lin = lambda a, w, b: jnp.einsum("bsd,df->bsf", a, w) + b
    q = lin(x, p["wq"], p["bq"]).reshape(B, S, num_heads, d_k).transpose(0, 2, 1, 3)
    k = lin(x, p["wk"], p["bk"]).reshape(B, S, num_heads, d_k).transpose(0, 2, 1, 3)
    v = lin(x, p["wv"], p["bv"]).reshape(B, S, num_heads, d_k).transpose(0, 2, 1, 3)
    scores = jnp.einsum("bhqd,bhkd->bhqk", q, k) / math.sqrt(d_k)
    pattn = jax.nn.softmax(scores, axis=-1)
    a = jnp.einsum("bhqk,bhkd->bhqd", pattn, v).transpose(0, 2, 1, 3).reshape(B, S, D)
    x = x + lin(a, p["wo"], p["bo"])
    x = _layer_norm(x, p["ln1_g"], p["ln1_b"])
    res = x
    h = jax.nn.relu(lin(x, p["w1"], p["b1"]))
    x = res + lin(h, p["w2"], p["b2"])
    return _layer_norm(x, p["ln2_g"], p["ln2_b"])


if __name__ == "__main__":
    # Small but lane/sublane-friendly shapes: S multiple of 8, D multiple of 128.
    B, S, D, H, L = 2, 16, 128, 4, 2         # batch, seq, d_model, heads, layers
    d_ff = D << 2                            # d_model << 2

    key = jax.random.PRNGKey(0)
    keys = jax.random.split(key, L + 1)
    x = jax.random.normal(keys[0], (B, S, D), jnp.float32)
    layer_params = [init_layer_params(keys[i + 1], D, d_ff) for i in range(L)]

    out, encoded = transformer_encoder_forward(x, layer_params, H)
    out = jax.block_until_ready(out)
    encoded = jax.block_until_ready(encoded)

    # verify against a pure-JAX f32 reference (kernel uses bf16 MXU operands,
    # hence the relaxed tolerance).
    xr = x
    ref_list = []
    for p in layer_params:
        xr = _ref_layer(xr, p, H)
        ref_list.append(xr)
    ref_enc = jnp.stack(ref_list, 0).transpose(1, 0, 2, 3)

    assert out.shape == (B, S, D)
    assert encoded.shape == (B, L, S, D)
    assert np.allclose(np.asarray(out), np.asarray(xr), rtol=2e-2, atol=2e-2)
    assert np.allclose(np.asarray(encoded), np.asarray(ref_enc), rtol=2e-2, atol=2e-2)

    print("KERNEL_OK")
</pallas_src>

<mosaic_0001>
module attributes {stable_mosaic.version = 11 : i64} {
  func.func @fused_encoder_kernel(%arg0: i32, %arg1: i32, %arg2: memref<1x16x128xf32, #tpu.memory_space<vmem>>, %arg3: memref<1x128x128xbf16, #tpu.memory_space<vmem>>, %arg4: memref<1x1x128xf32, #tpu.memory_space<vmem>>, %arg5: memref<1x128x128xbf16, #tpu.memory_space<vmem>>, %arg6: memref<1x1x128xf32, #tpu.memory_space<vmem>>, %arg7: memref<1x128x128xbf16, #tpu.memory_space<vmem>>, %arg8: memref<1x1x128xf32, #tpu.memory_space<vmem>>, %arg9: memref<1x128x128xbf16, #tpu.memory_space<vmem>>, %arg10: memref<1x1x128xf32, #tpu.memory_space<vmem>>, %arg11: memref<1x1x128xf32, #tpu.memory_space<vmem>>, %arg12: memref<1x1x128xf32, #tpu.memory_space<vmem>>, %arg13: memref<1x128x512xbf16, #tpu.memory_space<vmem>>, %arg14: memref<1x1x512xf32, #tpu.memory_space<vmem>>, %arg15: memref<1x512x128xbf16, #tpu.memory_space<vmem>>, %arg16: memref<1x1x128xf32, #tpu.memory_space<vmem>>, %arg17: memref<1x1x128xf32, #tpu.memory_space<vmem>>, %arg18: memref<1x1x128xf32, #tpu.memory_space<vmem>>, %arg19: memref<1x1x16x128xf32, #tpu.memory_space<vmem>>, %arg20: memref<16x128xf32, #tpu.memory_space<vmem>>) attributes {dimension_semantics = [#tpu.dimension_semantics<parallel>, #tpu.dimension_semantics<arbitrary>], iteration_bounds = array<i64: 2, 2>, scalar_prefetch = 0 : i64, scratch_operands = 1 : i64, tpu.core_type = #tpu.core_type<tc>, window_params = [{transform_indices = @transform_0, window_bounds = array<i64: 1, 16, 128>}, {transform_indices = @transform_1, window_bounds = array<i64: 1, 128, 128>}, {transform_indices = @transform_2, window_bounds = array<i64: 1, 1, 128>}, {transform_indices = @transform_3, window_bounds = array<i64: 1, 128, 128>}, {transform_indices = @transform_4, window_bounds = array<i64: 1, 1, 128>}, {transform_indices = @transform_5, window_bounds = array<i64: 1, 128, 128>}, {transform_indices = @transform_6, window_bounds = array<i64: 1, 1, 128>}, {transform_indices = @transform_7, window_bounds = array<i64: 1, 128, 128>}, {transform_indices = @transform_8, window_bounds = array<i64: 1, 1, 128>}, {transform_indices = @transform_9, window_bounds = array<i64: 1, 1, 128>}, {transform_indices = @transform_10, window_bounds = array<i64: 1, 1, 128>}, {transform_indices = @transform_11, window_bounds = array<i64: 1, 128, 512>}, {transform_indices = @transform_12, window_bounds = array<i64: 1, 1, 512>}, {transform_indices = @transform_13, window_bounds = array<i64: 1, 512, 128>}, {transform_indices = @transform_14, window_bounds = array<i64: 1, 1, 128>}, {transform_indices = @transform_15, window_bounds = array<i64: 1, 1, 128>}, {transform_indices = @transform_16, window_bounds = array<i64: 1, 1, 128>}, {transform_indices = @transform_17, window_bounds = array<i64: 1, 1, 16, 128>}]} {
    %c0_i32 = arith.constant 0 : i32
    %0 = arith.cmpi eq, %arg1, %c0_i32 : i32
    %1 = arith.extui %0 : i1 to i32
    %c0_i32_0 = arith.constant 0 : i32
    %2 = arith.cmpi ne, %1, %c0_i32_0 : i32
    scf.if %2 {
      %c0_77 = arith.constant 0 : index
      %c0_78 = arith.constant 0 : index
      %c0_79 = arith.constant 0 : index
      %136 = vector.load %arg2[%c0_77, %c0_78, %c0_79] : memref<1x16x128xf32, #tpu.memory_space<vmem>>, vector<1x16x128xf32>
      %137 = vector.shape_cast %136 : vector<1x16x128xf32> to vector<16x128xf32>
      %c0_80 = arith.constant 0 : index
      %c0_81 = arith.constant 0 : index
      %138 = vector.load %arg20[%c0_80, %c0_81] : memref<16x128xf32, #tpu.memory_space<vmem>>, vector<16x128xf32>
      tpu.vector_store %arg20[%c0_80, %c0_81], %137 {strides = array<i32>} : memref<16x128xf32, #tpu.memory_space<vmem>>, vector<16x128xf32>,
    } else {
    }
    %c0 = arith.constant 0 : index
    %c0_1 = arith.constant 0 : index
    %3 = vector.load %arg20[%c0, %c0_1] : memref<16x128xf32, #tpu.memory_space<vmem>>, vector<16x128xf32>
    %4 = arith.truncf %3 : vector<16x128xf32> to vector<16x128xbf16>
    %c0_2 = arith.constant 0 : index
    %c0_3 = arith.constant 0 : index
    %c0_4 = arith.constant 0 : index
    %5 = vector.load %arg3[%c0_2, %c0_3, %c0_4] : memref<1x128x128xbf16, #tpu.memory_space<vmem>>, vector<1x128x128xbf16>
    %6 = vector.shape_cast %5 : vector<1x128x128xbf16> to vector<128x128xbf16>
    %cst = arith.constant dense<0.000000e+00> : vector<16x128xf32>
    %7 = tpu.matmul %4, %6, %cst {dimension_numbers = #tpu.dot_dimension_numbers<[1], [0], [0], [1], [0, 0, 1, 1], [], []>} : vector<16x128xbf16>, vector<128x128xbf16>, vector<16x128xf32> -> vector<16x128xf32>
    %c0_5 = arith.constant 0 : index
    %c0_6 = arith.constant 0 : index
    %c0_7 = arith.constant 0 : index
    %8 = vector.load %arg4[%c0_5, %c0_6, %c0_7] : memref<1x1x128xf32, #tpu.memory_space<vmem>>, vector<1x1x128xf32>
    %9 = vector.shape_cast %8 : vector<1x1x128xf32> to vector<1x128xf32>
    %10 = vector.broadcast %9 : vector<1x128xf32> to vector<16x128xf32>
    %11 = arith.addf %7, %10 : vector<16x128xf32>
    %c0_8 = arith.constant 0 : index
    %c0_9 = arith.constant 0 : index
    %c0_10 = arith.constant 0 : index
    %12 = vector.load %arg5[%c0_8, %c0_9, %c0_10] : memref<1x128x128xbf16, #tpu.memory_space<vmem>>, vector<1x128x128xbf16>
    %13 = vector.shape_cast %12 : vector<1x128x128xbf16> to vector<128x128xbf16>
    %cst_11 = arith.constant dense<0.000000e+00> : vector<16x128xf32>
    %14 = tpu.matmul %4, %13, %cst_11 {dimension_numbers = #tpu.dot_dimension_numbers<[1], [0], [0], [1], [0, 0, 1, 1], [], []>} : vector<16x128xbf16>, vector<128x128xbf16>, vector<16x128xf32> -> vector<16x128xf32>
    %c0_12 = arith.constant 0 : index
    %c0_13 = arith.constant 0 : index
    %c0_14 = arith.constant 0 : index
    %15 = vector.load %arg6[%c0_12, %c0_13, %c0_14] : memref<1x1x128xf32, #tpu.memory_space<vmem>>, vector<1x1x128xf32>
    %16 = vector.shape_cast %15 : vector<1x1x128xf32> to vector<1x128xf32>
    %17 = vector.broadcast %16 : vector<1x128xf32> to vector<16x128xf32>
    %18 = arith.addf %14, %17 : vector<16x128xf32>
    %c0_15 = arith.constant 0 : index
    %c0_16 = arith.constant 0 : index
    %c0_17 = arith.constant 0 : index
    %19 = vector.load %arg7[%c0_15, %c0_16, %c0_17] : memref<1x128x128xbf16, #tpu.memory_space<vmem>>, vector<1x128x128xbf16>
    %20 = vector.shape_cast %19 : vector<1x128x128xbf16> to vector<128x128xbf16>
    %cst_18 = arith.constant dense<0.000000e+00> : vector<16x128xf32>
    %21 = tpu.matmul %4, %20, %cst_18 {dimension_numbers = #tpu.dot_dimension_numbers<[1], [0], [0], [1], [0, 0, 1, 1], [], []>} : vector<16x128xbf16>, vector<128x128xbf16>, vector<16x128xf32> -> vector<16x128xf32>
    %c0_19 = arith.constant 0 : index
    %c0_20 = arith.constant 0 : index
    %c0_21 = arith.constant 0 : index
    %22 = vector.load %arg8[%c0_19, %c0_20, %c0_21] : memref<1x1x128xf32, #tpu.memory_space<vmem>>, vector<1x1x128xf32>
    %23 = vector.shape_cast %22 : vector<1x1x128xf32> to vector<1x128xf32>
    %24 = vector.broadcast %23 : vector<1x128xf32> to vector<16x128xf32>
    %25 = arith.addf %21, %24 : vector<16x128xf32>
    %26 = vector.shape_cast %11 : vector<16x128xf32> to vector<16x4x32xf32>
    %27 = tpu.transpose %26, [1, 0, 2] : vector<16x4x32xf32> -> vector<4x16x32xf32>
    %28 = arith.truncf %27 : vector<4x16x32xf32> to vector<4x16x32xbf16>
    %29 = vector.shape_cast %18 : vector<16x128xf32> to vector<16x4x32xf32>
    %30 = tpu.transpose %29, [1, 0, 2] : vector<16x4x32xf32> -> vector<4x16x32xf32>
    %31 = arith.truncf %30 : vector<4x16x32xf32> to vector<4x16x32xbf16>
    %32 = vector.shape_cast %25 : vector<16x128xf32> to vector<16x4x32xf32>
    %33 = tpu.transpose %32, [1, 0, 2] : vector<16x4x32xf32> -> vector<4x16x32xf32>
    %34 = arith.truncf %33 : vector<4x16x32xf32> to vector<4x16x32xbf16>
    "tpu.trace_start"() <{level = 10 : i32, message = "hqd,hkd->hqk"}> : () -> ()
    %cst_22 = arith.constant dense<0.000000e+00> : vector<4x16x16xf32>
    %35 = tpu.matmul %28, %31, %cst_22 {dimension_numbers = #tpu.dot_dimension_numbers<[2], [2], [1], [1], [0, 0, 0, 1, 1, 1], [0], [0]>} : vector<4x16x32xbf16>, vector<4x16x32xbf16>, vector<4x16x16xf32> -> vector<4x16x16xf32>
    "tpu.trace_stop"() : () -> ()
    %cst_23 = arith.constant 0.176776692 : f32
    %36 = vector.broadcast %cst_23 : f32 to vector<4x16x16xf32>
    %37 = arith.mulf %35, %36 : vector<4x16x16xf32>
    %cst_24 = arith.constant dense<0xFF800000> : vector<4x16xf32>
    %38 = vector.multi_reduction <maximumf>, %37, %cst_24 [2] : vector<4x16x16xf32> to vector<4x16xf32>
    %39 = vector.shape_cast %38 : vector<4x16xf32> to vector<4x16x1xf32>
    %40 = vector.broadcast %39 : vector<4x16x1xf32> to vector<4x16x16xf32>
    %41 = arith.subf %37, %40 : vector<4x16x16xf32>
    %42 = math.exp %41 : vector<4x16x16xf32>
    %cst_25 = arith.constant dense<0.000000e+00> : vector<4x16xf32>
    %43 = vector.multi_reduction <add>, %42, %cst_25 [2] : vector<4x16x16xf32> to vector<4x16xf32>
    %44 = vector.shape_cast %43 : vector<4x16xf32> to vector<4x16x1xf32>
    %45 = tpu.reciprocal %44 {approx = true} : vector<4x16x1xf32> -> vector<4x16x1xf32>
    %46 = vector.broadcast %45 : vector<4x16x1xf32> to vector<4x16x16xf32>
    %47 = arith.mulf %42, %46 : vector<4x16x16xf32>
    %48 = arith.truncf %47 : vector<4x16x16xf32> to vector<4x16x16xbf16>
    "tpu.trace_start"() <{level = 10 : i32, message = "hqk,hkd->hqd"}> : () -> ()
    %cst_26 = arith.constant dense<0.000000e+00> : vector<4x16x32xf32>
    %49 = tpu.matmul %48, %34, %cst_26 {dimension_numbers = #tpu.dot_dimension_numbers<[2], [1], [1], [2], [0, 0, 0, 1, 1, 2], [0], [0]>} : vector<4x16x16xbf16>, vector<4x16x32xbf16>, vector<4x16x32xf32> -> vector<4x16x32xf32>
    "tpu.trace_stop"() : () -> ()
    %50 = tpu.transpose %49, [1, 0, 2] : vector<4x16x32xf32> -> vector<16x4x32xf32>
    %51 = vector.shape_cast %50 : vector<16x4x32xf32> to vector<16x128xf32>
    %52 = arith.truncf %51 : vector<16x128xf32> to vector<16x128xbf16>
    %c0_27 = arith.constant 0 : index
    %c0_28 = arith.constant 0 : index
    %c0_29 = arith.constant 0 : index
    %53 = vector.load %arg9[%c0_27, %c0_28, %c0_29] : memref<1x128x128xbf16, #tpu.memory_space<vmem>>, vector<1x128x128xbf16>
    %54 = vector.shape_cast %53 : vector<1x128x128xbf16> to vector<128x128xbf16>
    %cst_30 = arith.constant dense<0.000000e+00> : vector<16x128xf32>
    %55 = tpu.matmul %52, %54, %cst_30 {dimension_numbers = #tpu.dot_dimension_numbers<[1], [0], [0], [1], [0, 0, 1, 1], [], []>} : vector<16x128xbf16>, vector<128x128xbf16>, vector<16x128xf32> -> vector<16x128xf32>
    %c0_31 = arith.constant 0 : index
    %c0_32 = arith.constant 0 : index
    %c0_33 = arith.constant 0 : index
    %56 = vector.load %arg10[%c0_31, %c0_32, %c0_33] : memref<1x1x128xf32, #tpu.memory_space<vmem>>, vector<1x1x128xf32>
    %57 = vector.shape_cast %56 : vector<1x1x128xf32> to vector<1x128xf32>
    %58 = vector.broadcast %57 : vector<1x128xf32> to vector<16x128xf32>
    %59 = arith.addf %55, %58 : vector<16x128xf32>
    %60 = arith.addf %3, %59 : vector<16x128xf32>
    %c0_34 = arith.constant 0 : index
    %c0_35 = arith.constant 0 : index
    %c0_36 = arith.constant 0 : index
    %61 = vector.load %arg11[%c0_34, %c0_35, %c0_36] : memref<1x1x128xf32, #tpu.memory_space<vmem>>, vector<1x1x128xf32>
    %62 = vector.shape_cast %61 : vector<1x1x128xf32> to vector<1x128xf32>
    %c0_37 = arith.constant 0 : index
    %c0_38 = arith.constant 0 : index
    %c0_39 = arith.constant 0 : index
    %63 = vector.load %arg12[%c0_37, %c0_38, %c0_39] : memref<1x1x128xf32, #tpu.memory_space<vmem>>, vector<1x1x128xf32>
    %64 = vector.shape_cast %63 : vector<1x1x128xf32> to vector<1x128xf32>
    %cst_40 = arith.constant dense<0.000000e+00> : vector<16xf32>
    %65 = vector.multi_reduction <add>, %60, %cst_40 [1] : vector<16x128xf32> to vector<16xf32>
    %66 = vector.shape_cast %65 : vector<16xf32> to vector<16x1xf32>
    %cst_41 = arith.constant 1.280000e+02 : f32
    %67 = vector.broadcast %cst_41 : f32 to vector<16x1xf32>
    %68 = arith.divf %66, %67 : vector<16x1xf32>
    %69 = vector.broadcast %68 : vector<16x1xf32> to vector<16x128xf32>
    %70 = arith.subf %60, %69 : vector<16x128xf32>
    %71 = arith.mulf %70, %70 : vector<16x128xf32>
    %cst_42 = arith.constant dense<0.000000e+00> : vector<16xf32>
    %72 = vector.multi_reduction <add>, %71, %cst_42 [1] : vector<16x128xf32> to vector<16xf32>
    %73 = vector.shape_cast %72 : vector<16xf32> to vector<16x1xf32>
    %cst_43 = arith.constant 1.280000e+02 : f32
    %74 = vector.broadcast %cst_43 : f32 to vector<16x1xf32>
    %75 = arith.divf %73, %74 : vector<16x1xf32>
    %76 = vector.broadcast %68 : vector<16x1xf32> to vector<16x128xf32>
    %77 = arith.subf %60, %76 : vector<16x128xf32>
    %cst_44 = arith.constant 9.99999974E-6 : f32
    %78 = vector.broadcast %cst_44 : f32 to vector<16x1xf32>
    %79 = arith.addf %75, %78 : vector<16x1xf32>
    %80 = math.rsqrt %79 : vector<16x1xf32>
    %81 = vector.broadcast %80 : vector<16x1xf32> to vector<16x128xf32>
    %82 = arith.mulf %77, %81 : vector<16x128xf32>
    %83 = vector.broadcast %62 : vector<1x128xf32> to vector<16x128xf32>
    %84 = arith.mulf %82, %83 : vector<16x128xf32>
    %85 = vector.broadcast %64 : vector<1x128xf32> to vector<16x128xf32>
    %86 = arith.addf %84, %85 : vector<16x128xf32>
    %87 = arith.truncf %86 : vector<16x128xf32> to vector<16x128xbf16>
    %c0_45 = arith.constant 0 : index
    %c0_46 = arith.constant 0 : index
    %c0_47 = arith.constant 0 : index
    %88 = vector.load %arg13[%c0_45, %c0_46, %c0_47] : memref<1x128x512xbf16, #tpu.memory_space<vmem>>, vector<1x128x512xbf16>
    %89 = vector.shape_cast %88 : vector<1x128x512xbf16> to vector<128x512xbf16>
    %cst_48 = arith.constant dense<0.000000e+00> : vector<16x512xf32>
    %90 = tpu.matmul %87, %89, %cst_48 {dimension_numbers = #tpu.dot_dimension_numbers<[1], [0], [0], [1], [0, 0, 1, 1], [], []>} : vector<16x128xbf16>, vector<128x512xbf16>, vector<16x512xf32> -> vector<16x512xf32>
    %c0_49 = arith.constant 0 : index
    %c0_50 = arith.constant 0 : index
    %c0_51 = arith.constant 0 : index
    %91 = vector.load %arg14[%c0_49, %c0_50, %c0_51] : memref<1x1x512xf32, #tpu.memory_space<vmem>>, vector<1x1x512xf32>
    %92 = vector.shape_cast %91 : vector<1x1x512xf32> to vector<1x512xf32>
    %93 = vector.broadcast %92 : vector<1x512xf32> to vector<16x512xf32>
    %94 = arith.addf %90, %93 : vector<16x512xf32>
    %cst_52 = arith.constant 0.000000e+00 : f32
    %95 = vector.broadcast %cst_52 : f32 to vector<16x512xf32>
    %96 = arith.maximumf %94, %95 : vector<16x512xf32>
    %97 = arith.truncf %96 : vector<16x512xf32> to vector<16x512xbf16>
    %c0_53 = arith.constant 0 : index
    %c0_54 = arith.constant 0 : index
    %c0_55 = arith.constant 0 : index
    %98 = vector.load %arg15[%c0_53, %c0_54, %c0_55] : memref<1x512x128xbf16, #tpu.memory_space<vmem>>, vector<1x512x128xbf16>
    %99 = vector.shape_cast %98 : vector<1x512x128xbf16> to vector<512x128xbf16>
    %cst_56 = arith.constant dense<0.000000e+00> : vector<16x128xf32>
    %100 = tpu.matmul %97, %99, %cst_56 {dimension_numbers = #tpu.dot_dimension_numbers<[1], [0], [0], [1], [0, 0, 1, 1], [], []>} : vector<16x512xbf16>, vector<512x128xbf16>, vector<16x128xf32> -> vector<16x128xf32>
    %c0_57 = arith.constant 0 : index
    %c0_58 = arith.constant 0 : index
    %c0_59 = arith.constant 0 : index
    %101 = vector.load %arg16[%c0_57, %c0_58, %c0_59] : memref<1x1x128xf32, #tpu.memory_space<vmem>>, vector<1x1x128xf32>
    %102 = vector.shape_cast %101 : vector<1x1x128xf32> to vector<1x128xf32>
    %103 = vector.broadcast %102 : vector<1x128xf32> to vector<16x128xf32>
    %104 = arith.addf %100, %103 : vector<16x128xf32>
    %105 = arith.addf %86, %104 : vector<16x128xf32>
    %c0_60 = arith.constant 0 : index
    %c0_61 = arith.constant 0 : index
    %c0_62 = arith.constant 0 : index
    %106 = vector.load %arg17[%c0_60, %c0_61, %c0_62] : memref<1x1x128xf32, #tpu.memory_space<vmem>>, vector<1x1x128xf32>
    %107 = vector.shape_cast %106 : vector<1x1x128xf32> to vector<1x128xf32>
    %c0_63 = arith.constant 0 : index
    %c0_64 = arith.constant 0 : index
    %c0_65 = arith.constant 0 : index
    %108 = vector.load %arg18[%c0_63, %c0_64, %c0_65] : memref<1x1x128xf32, #tpu.memory_space<vmem>>, vector<1x1x128xf32>
    %109 = vector.shape_cast %108 : vector<1x1x128xf32> to vector<1x128xf32>
    %cst_66 = arith.constant dense<0.000000e+00> : vector<16xf32>
    %110 = vector.multi_reduction <add>, %105, %cst_66 [1] : vector<16x128xf32> to vector<16xf32>
    %111 = vector.shape_cast %110 : vector<16xf32> to vector<16x1xf32>
    %cst_67 = arith.constant 1.280000e+02 : f32
    %112 = vector.broadcast %cst_67 : f32 to vector<16x1xf32>
    %113 = arith.divf %111, %112 : vector<16x1xf32>
    %114 = vector.broadcast %113 : vector<16x1xf32> to vector<16x128xf32>
    %115 = arith.subf %105, %114 : vector<16x128xf32>
    %116 = arith.mulf %115, %115 : vector<16x128xf32>
    %cst_68 = arith.constant dense<0.000000e+00> : vector<16xf32>
    %117 = vector.multi_reduction <add>, %116, %cst_68 [1] : vector<16x128xf32> to vector<16xf32>
    %118 = vector.shape_cast %117 : vector<16xf32> to vector<16x1xf32>
    %cst_69 = arith.constant 1.280000e+02 : f32
    %119 = vector.broadcast %cst_69 : f32 to vector<16x1xf32>
    %120 = arith.divf %118, %119 : vector<16x1xf32>
    %121 = vector.broadcast %113 : vector<16x1xf32> to vector<16x128xf32>
    %122 = arith.subf %105, %121 : vector<16x128xf32>
    %cst_70 = arith.constant 9.99999974E-6 : f32
    %123 = vector.broadcast %cst_70 : f32 to vector<16x1xf32>
    %124 = arith.addf %120, %123 : vector<16x1xf32>
    %125 = math.rsqrt %124 : vector<16x1xf32>
    %126 = vector.broadcast %125 : vector<16x1xf32> to vector<16x128xf32>
    %127 = arith.mulf %122, %126 : vector<16x128xf32>
    %128 = vector.broadcast %107 : vector<1x128xf32> to vector<16x128xf32>
    %129 = arith.mulf %127, %128 : vector<16x128xf32>
    %130 = vector.broadcast %109 : vector<1x128xf32> to vector<16x128xf32>
    %131 = arith.addf %129, %130 : vector<16x128xf32>
    %c0_71 = arith.constant 0 : index
    %c0_72 = arith.constant 0 : index
    %132 = vector.load %arg20[%c0_71, %c0_72] : memref<16x128xf32, #tpu.memory_space<vmem>>, vector<16x128xf32>
    tpu.vector_store %arg20[%c0_71, %c0_72], %131 {strides = array<i32>} : memref<16x128xf32, #tpu.memory_space<vmem>>, vector<16x128xf32>,
    %c0_73 = arith.constant 0 : index
    %c0_74 = arith.constant 0 : index
    %c0_75 = arith.constant 0 : index
    %c0_76 = arith.constant 0 : index
    %133 = vector.load %arg19[%c0_73, %c0_74, %c0_75, %c0_76] : memref<1x1x16x128xf32, #tpu.memory_space<vmem>>, vector<1x1x16x128xf32>
    %134 = vector.shape_cast %133 : vector<1x1x16x128xf32> to vector<16x128xf32>
    %135 = vector.shape_cast %131 : vector<16x128xf32> to vector<1x1x16x128xf32>
    tpu.vector_store %arg19[%c0_73, %c0_74, %c0_75, %c0_76], %135 {strides = array<i32>} : memref<1x1x16x128xf32, #tpu.memory_space<vmem>>, vector<1x1x16x128xf32>,
    return
  }
  func.func @transform_0(%arg0: i32, %arg1: i32) -> (i32, i32, i32) {
    %c0_i32 = arith.constant 0 : i32
    %c0_i32_0 = arith.constant 0 : i32
    %c0_i32_1 = arith.constant 0 : i32
    return %arg0, %c0_i32, %c0_i32_0 : i32, i32, i32
  }
  func.func @transform_1(%arg0: i32, %arg1: i32) -> (i32, i32, i32) {
    %c0_i32 = arith.constant 0 : i32
    %c0_i32_0 = arith.constant 0 : i32
    %c0_i32_1 = arith.constant 0 : i32
    return %arg1, %c0_i32, %c0_i32_0 : i32, i32, i32
  }
  func.func @transform_2(%arg0: i32, %arg1: i32) -> (i32, i32, i32) {
    %c0_i32 = arith.constant 0 : i32
    %c0_i32_0 = arith.constant 0 : i32
    %c0_i32_1 = arith.constant 0 : i32
    return %arg1, %c0_i32, %c0_i32_0 : i32, i32, i32
  }
  func.func @transform_3(%arg0: i32, %arg1: i32) -> (i32, i32, i32) {
    %c0_i32 = arith.constant 0 : i32
    %c0_i32_0 = arith.constant 0 : i32
    %c0_i32_1 = arith.constant 0 : i32
    return %arg1, %c0_i32, %c0_i32_0 : i32, i32, i32
  }
  func.func @transform_4(%arg0: i32, %arg1: i32) -> (i32, i32, i32) {
    %c0_i32 = arith.constant 0 : i32
    %c0_i32_0 = arith.constant 0 : i32
    %c0_i32_1 = arith.constant 0 : i32
    return %arg1, %c0_i32, %c0_i32_0 : i32, i32, i32
  }
  func.func @transform_5(%arg0: i32, %arg1: i32) -> (i32, i32, i32) {
    %c0_i32 = arith.constant 0 : i32
    %c0_i32_0 = arith.constant 0 : i32
    %c0_i32_1 = arith.constant 0 : i32
    return %arg1, %c0_i32, %c0_i32_0 : i32, i32, i32
  }
  func.func @transform_6(%arg0: i32, %arg1: i32) -> (i32, i32, i32) {
    %c0_i32 = arith.constant 0 : i32
    %c0_i32_0 = arith.constant 0 : i32
    %c0_i32_1 = arith.constant 0 : i32
    return %arg1, %c0_i32, %c0_i32_0 : i32, i32, i32
  }
  func.func @transform_7(%arg0: i32, %arg1: i32) -> (i32, i32, i32) {
    %c0_i32 = arith.constant 0 : i32
    %c0_i32_0 = arith.constant 0 : i32
    %c0_i32_1 = arith.constant 0 : i32
    return %arg1, %c0_i32, %c0_i32_0 : i32, i32, i32
  }
  func.func @transform_8(%arg0: i32, %arg1: i32) -> (i32, i32, i32) {
    %c0_i32 = arith.constant 0 : i32
    %c0_i32_0 = arith.constant 0 : i32
    %c0_i32_1 = arith.constant 0 : i32
    return %arg1, %c0_i32, %c0_i32_0 : i32, i32, i32
  }
  func.func @transform_9(%arg0: i32, %arg1: i32) -> (i32, i32, i32) {
    %c0_i32 = arith.constant 0 : i32
    %c0_i32_0 = arith.constant 0 : i32
    %c0_i32_1 = arith.constant 0 : i32
    return %arg1, %c0_i32, %c0_i32_0 : i32, i32, i32
  }
  func.func @transform_10(%arg0: i32, %arg1: i32) -> (i32, i32, i32) {
    %c0_i32 = arith.constant 0 : i32
    %c0_i32_0 = arith.constant 0 : i32
    %c0_i32_1 = arith.constant 0 : i32
    return %arg1, %c0_i32, %c0_i32_0 : i32, i32, i32
  }
  func.func @transform_11(%arg0: i32, %arg1: i32) -> (i32, i32, i32) {
    %c0_i32 = arith.constant 0 : i32
    %c0_i32_0 = arith.constant 0 : i32
    %c0_i32_1 = arith.constant 0 : i32
    return %arg1, %c0_i32, %c0_i32_0 : i32, i32, i32
  }
  func.func @transform_12(%arg0: i32, %arg1: i32) -> (i32, i32, i32) {
    %c0_i32 = arith.constant 0 : i32
    %c0_i32_0 = arith.constant 0 : i32
    %c0_i32_1 = arith.constant 0 : i32
    return %arg1, %c0_i32, %c0_i32_0 : i32, i32, i32
  }
  func.func @transform_13(%arg0: i32, %arg1: i32) -> (i32, i32, i32) {
    %c0_i32 = arith.constant 0 : i32
    %c0_i32_0 = arith.constant 0 : i32
    %c0_i32_1 = arith.constant 0 : i32
    return %arg1, %c0_i32, %c0_i32_0 : i32, i32, i32
  }
  func.func @transform_14(%arg0: i32, %arg1: i32) -> (i32, i32, i32) {
    %c0_i32 = arith.constant 0 : i32
    %c0_i32_0 = arith.constant 0 : i32
    %c0_i32_1 = arith.constant 0 : i32
    return %arg1, %c0_i32, %c0_i32_0 : i32, i32, i32
  }
  func.func @transform_15(%arg0: i32, %arg1: i32) -> (i32, i32, i32) {
    %c0_i32 = arith.constant 0 : i32
    %c0_i32_0 = arith.constant 0 : i32
    %c0_i32_1 = arith.constant 0 : i32
    return %arg1, %c0_i32, %c0_i32_0 : i32, i32, i32
  }
  func.func @transform_16(%arg0: i32, %arg1: i32) -> (i32, i32, i32) {
    %c0_i32 = arith.constant 0 : i32
    %c0_i32_0 = arith.constant 0 : i32
    %c0_i32_1 = arith.constant 0 : i32
    return %arg1, %c0_i32, %c0_i32_0 : i32, i32, i32
  }
  func.func @transform_17(%arg0: i32, %arg1: i32) -> (i32, i32, i32, i32) {
    %c0_i32 = arith.constant 0 : i32
    %c0_i32_0 = arith.constant 0 : i32
    %c0_i32_1 = arith.constant 0 : i32
    return %arg0, %arg1, %c0_i32, %c0_i32_0 : i32, i32, i32, i32
  }
}

</mosaic_0001>

<bundles_post_ra>
// kernel: tpu_custom_call.1
= control target key start
LH: loop header
LB: loop body
LE: loop exit
PB: predicated region body
PF: predicated region fallthrough
CT: control target
= control target key end

     0   :  { %s6501_s0 = inlined_call_operand.hbm [shape: f32[2,16,128], index: 0, kind: input, shape index: {}]   ;;  %s6502_s1 = inlined_call_operand.hbm [shape: bf16[2,128,128], index: 1, kind: input, shape index: {}]   ;;  %s6503_s2 = inlined_call_operand.vmem [shape: f32[2,1,128], index: 2, kind: input, shape index: {}]   ;;  %s6504_s3 = inlined_call_operand.hbm [shape: bf16[2,128,128], index: 3, kind: input, shape index: {}]   ;;  %s6505_s4 = inlined_call_operand.vmem [shape: f32[2,1,128], index: 4, kind: input, shape index: {}]   ;;  %s6506_s5 = inlined_call_operand.hbm [shape: bf16[2,128,128], index: 5, kind: input, shape index: {}]   ;;  %s6507_s6 = inlined_call_operand.vmem [shape: f32[2,1,128], index: 6, kind: input, shape index: {}]   ;;  %s6508_s7 = inlined_call_operand.hbm [shape: bf16[2,128,128], index: 7, kind: input, shape index: {}]   ;;  %s6509_s8 = inlined_call_operand.vmem [shape: f32[2,1,128], index: 8, kind: input, shape index: {}]   ;;  %s6510_s9 = inlined_call_operand.vmem [shape: f32[2,1,128], index: 9, kind: input, shape index: {}]   ;;  %s6511_s10 = inlined_call_operand.vmem [shape: f32[2,1,128], index: 10, kind: input, shape index: {}]   ;;  %s6512_s11 = inlined_call_operand.hbm [shape: bf16[2,128,512], index: 11, kind: input, shape index: {}]   ;;  %s6513_s12 = inlined_call_operand.vmem [shape: f32[2,1,512], index: 12, kind: input, shape index: {}]   ;;  %s6514_s13 = inlined_call_operand.hbm [shape: bf16[2,512,128], index: 13, kind: input, shape index: {}]   ;;  %s6515_s14 = inlined_call_operand.vmem [shape: f32[2,1,128], index: 14, kind: input, shape index: {}]   ;;  %s6516_s15 = inlined_call_operand.vmem [shape: f32[2,1,128], index: 15, kind: input, shape index: {}]   ;;  %s6517_s16 = inlined_call_operand.vmem [shape: f32[2,1,128], index: 16, kind: input, shape index: {}]   ;;  %s6518_s17 = inlined_call_operand.hbm [shape: f32[2,2,16,128], index: 17, kind: output, shape index: {}]  }
   0x1   :  { %6569 = sst [smem:[#allocation45_spill]] %s6501_s0 }
   0x2   :  { %6570 = sst [smem:[#allocation46_spill]] %s6502_s1 }
   0x3   :  { %6571 = sst [smem:[#allocation47_spill]] %s6503_s2 }
   0x4   :  { %6572 = sst [smem:[#allocation48_spill]] %s6504_s3 }
   0x5   :  { %6573 = sst [smem:[#allocation49_spill]] %s6505_s4 }
   0x6   :  { %6574 = sst [smem:[#allocation50_spill]] %s6506_s5 }
   0x7   :  { %6575 = sst [smem:[#allocation51_spill]] %s6507_s6 }
   0x8   :  { %6576 = sst [smem:[#allocation52_spill]] %s6508_s7 }
   0x9   :  { %6577 = sst [smem:[#allocation53_spill]] %s6509_s8 }
   0xa   :  { %6578 = sst [smem:[#allocation54_spill]] %s6510_s9 }
   0xb   :  { %6579 = sst [smem:[#allocation55_spill]] %s6511_s10 }
   0xc   :  { %6580 = sst [smem:[#allocation56_spill]] %s6512_s11 }
   0xd   :  { %6581 = sst [smem:[#allocation57_spill]] %s6513_s12 }
   0xe   :  { %6582 = sst [smem:[#allocation58_spill]] %s6514_s13 }
   0xf   :  { %6583 = sst [smem:[#allocation59_spill]] %s6515_s14 }
  0x10   :  { %6584 = sst [smem:[#allocation60_spill]] %s6516_s15 }
  0x11   :  { %6585 = sst [smem:[#allocation61_spill]] %s6517_s16 }
  0x12   :  { %6586 = sst [smem:[#allocation62_spill]] %s6518_s17 }
  0x13   :  { %22 = vsyncpa [#allocation4], 0 }
  0x14   :  { %24 = vsyncpa [#allocation4 + $0x1], 0 }
  0x15   :  { %25 = vsyncpa [#allocation7], 0 }
  0x16   :  { %27 = vsyncpa [#allocation7 + $0x1], 0 }
  0x17   :  { %28 = vsyncpa [#allocation10], 0 }
  0x18   :  { %30 = vsyncpa [#allocation10 + $0x1], 0 }
  0x19   :  { %31 = vsyncpa [#allocation13], 0 }
  0x1a   :  { %33 = vsyncpa [#allocation13 + $0x1], 0 }
  0x1b   :  { %34 = vsyncpa [#allocation5], 0 }
  0x1c   :  { %36 = vsyncpa [#allocation5 + $0x1], 0  ;;  %s5373_s24 = smov 0   ;;  %s5375_s25 = smov 0  }
  0x1d   :  { %s5377_s26 = smov 0   ;;  %s5379_s27 = smov 0  }
  0x1e   :  { %s5381_s28 = smov 0   ;;  %s5383_s29 = smov 0  }
  0x1f   :  { %s5385_s0 = smov 0   ;;  %s5387_s30 = smov 0  }
  0x20   :  { %s5389_s18 = smov 0   ;;  %s5391_s19 = smov 0  }
  0x21   :  { %s5393_s1 = smov 0   ;;  %s5395_s20 = smov 0  }
  0x22   :  { %s5397_s21 = smov 0   ;;  %s5399_s22 = smov 0  }
  0x23 LB: > { %6587 = sst [smem:[#allocation21_spill]] %s5205_s24  ;;  %p6526_p0 = scmp.eq.s32.totalorder %s5257_s22, 0  ;;  %s5257_s22 = sphi %s5399_s22, %s42_s22   ;;  %s5253_s21 = sphi %s5397_s21, %s6704_s21   ;;  %s5249_s20 = sphi %s5395_s20, %s6703_s20   ;;  %s5245_s1 = sphi %s5393_s1, %s6702_s1   ;;  %s5241_s19 = sphi %s5391_s19, %s6701_s19   ;;  %s5237_s18 = sphi %s5389_s18, %s6700_s18   ;;  %s5233_s30 = sphi %s5387_s30, %s6699_s30   ;;  %s5229_s0 = sphi %s5385_s0, %s6698_s0   ;;  %s5225_s29 = sphi %s5383_s29, %s6697_s29   ;;  %s5221_s28 = sphi %s5381_s28, %s6696_s28   ;;  %s5217_s27 = sphi %s5379_s27, %s6695_s27   ;;  %s5213_s26 = sphi %s5377_s26, %s6694_s26   ;;  %s5209_s25 = sphi %s5375_s25, %s6693_s25   ;;  %s5205_s24 = sphi %s5373_s24, %s6692_s24  }
  0x24   : > { %6588 = sst [smem:[#allocation22_spill]] %s5209_s25  ;;  %p94_p1 = scmp.ne.s32.totalorder %s5225_s29, %s5221_s28 }
  0x25   : > { %6589 = sst [smem:[#allocation23_spill]] %s5213_s26  ;;  %p6525_p4 = scmp.lt.s32.totalorder %s5257_s22, 4 }
  0x26   : > { %6590 = sst [smem:[#allocation24_spill]] %s5221_s28  ;;  %p96_p3 = por %p94_p1, %p6526_p0 }
  0x27   : > { %6591 = sst [smem:[#allocation25_spill]] %s5225_s29  ;;  %s6522_s16 = sand.u32 1, %s5225_s29  }
  0x28   : > { %6592 = sst [smem:[#allocation26_spill]] %s5233_s30  ;;  %s5459_s15 = sshll.u32 %s6522_s16, 6 }
  0x29   : > { %6593 = sst [smem:[#allocation27_spill]] %s5237_s18  ;;  %s5462_s12 = sshll.u32 %s5249_s20, 10 }
  0x2a   : > { %6594 = sst [smem:[#allocation28_spill]] %s5241_s19  ;;  %s6600_s10 = sld [smem:[#allocation46_spill]] }
  0x2b   : > { %6595 = sst [smem:[#allocation29_spill]] %s5245_s1  ;;  %s5454_s1 = sand.u32 1, %s5257_s22  }
  0x2c   : > { %6596 = sst [smem:[#allocation30_spill]] %s5249_s20  ;;  %s567_s9 = scalar_lea.vmem [#allocation6], %s5459_s15 }
  0x2d   : > { %6597 = sst [smem:[#allocation31_spill]] %s5253_s21  ;;  %s574_s8 = sshll.u32 %s567_s9, 4  ;;  %s5471_s8 = int_to_ptr.vmem [resolvable:$true] %s574_s8 }
  0x2e   : > { %6598 = sst [smem:[#allocation32_spill]] %s5257_s22  ;;  %p5475_p5 = pnand %p6525_p4, %p96_p3 }
  0x2f   : > { %6599 = sst [smem:[#allocation33_spill]] %s5459_s15 }
  0x30   : > { %s5468_s17 = scalar_lea.hbm %s6600_s10, %s5462_s12  ;;  %p5485_p8 = pneg %p5475_p5 }
  0x31   : > { %s6601_s16 = scalar_select %p5475_p5, 1, 0 }
  0x32   : > { %s4889_s4 = scalar_lea.hbm %s5468_s17, 1024  ;;  %s4894_s2 = scalar_lea.hbm %s6600_s10, 2048 }
  0x33   : > { %p4890_p7 = scmp.ne.s32.totalorder %s5468_s17, %s4889_s4  ;;  %p4895_p11 = scmp.lt.u32.totalorder %s5468_s17, %s6600_s10 }
  0x34   : > { %s6602_s14 = scalar_select %p5485_p8, 1, 0 }
  0x35   : > { %p4892_p9 = pnand %p5485_p8, %p4890_p7  ;;  %p4896_p12 = scmp.lt.u32.totalorder %s4894_s2, %s4889_s4 }
  0x36   : > { %6603 = sst [smem:[#allocation34_spill]] %s6602_s14  ;;  %p4898_p1 = scmp.lt.u32.totalorder %s4889_s4, %s5468_s17 }
  0x37   : > { %p4893_p10 = pneg %p4892_p9  ;;  %p4897_p13 = por %p4896_p12, %p4895_p11 }
  0x39   : > { %p4899_p3 = por %p4898_p1, %p4897_p13 }
  0x3b   : > { %p4900_p4 = pnand %p4899_p3, %p4893_p10 }
  0x3d   : > { %4903 = shalt.err (!%p4900_p4)
}
  0x3e   : > { %s4904_s6 = scalar_lea.vmem %s5471_s8, 1024  ;;  %s5259_s9 = smov [#allocation6]  }
  0x3f   : > { %p4905_p7 = scmp.ne.s32.totalorder %s5471_s8, %s4904_s6  ;;  %s4909_s23 = sshll.u32 %s5259_s9, 4  ;;  %s4910_s23 = int_to_ptr.vmem [resolvable:$false] %s4909_s23 }
  0x40   : > { %s4911_s7 = scalar_lea.vmem %s4910_s23, 2048  ;;  %p4912_p0 = scmp.lt.s32.totalorder %s5471_s8, %s4910_s23 }
  0x41   : > { %p4907_p9 = pnand %p4905_p7, %p5485_p8  ;;  %p4913_p6 = scmp.lt.s32.totalorder %s4911_s7, %s4904_s6 }
  0x43   : > { %p4908_p2 = pneg %p4907_p9  ;;  %p4914_p11 = por %p4913_p6, %p4912_p0 }
  0x45   : > { %p4915_p12 = pnand %p4914_p11, %p4908_p2 }
  0x47   : > { %4918 = shalt.err (!%p4915_p12)
}
  0x48   : > { %s6529_s2 = smov 64   ;;  %s6531_s4 = smov 4  }
  0x49   : > { %s6604_s6 = scalar_lea.sflag [#allocation7], %s5454_s1  ;;  %p748_p0 = scmp.lt.s32.totalorder %s5257_s22, 5 }
  0x4a   : > { %4570 = dma.hbm_to_vmem [thread:$0]  (!%p5475_p5), %s5468_s17, 1024, %s5471_s8, %s6604_s6, %s6529_s2, %s6529_s2, %s6531_s4  }
  0x4b   : > { %s6605_s5 = sld [smem:[#allocation50_spill]]  ;;  %p6606_p2 = scmp.ge.s32.totalorder %s5257_s22, 1 }
  0x4c   : > { %s621_s10 = scalar_lea.vmem [#allocation9], %s5459_s15  ;;  %s6536_s8 = scalar_lea.sflag [#allocation10], %s5454_s1 }
  0x4d   : > { %p5522_p4 = pnand %p6606_p2, %p748_p0  ;;  %s628_s3 = sshll.u32 %s621_s10, 4  ;;  %s5527_s3 = int_to_ptr.vmem [resolvable:$true] %s628_s3 }
  0x4f   : > { %s6607_s7 = scalar_select %p5522_p4, 1, 0 }
  0x51   : > { %s5518_s23 = scalar_lea.hbm %s6605_s5, %s5462_s12  ;;  %6608 = sst [smem:[#allocation35_spill]] %s6607_s7 }
  0x52   : > { %s4919_s17 = scalar_lea.hbm %s5518_s23, 1024  ;;  %s4924_s9 = scalar_lea.hbm %s6605_s5, 2048 }
  0x53   : > { %p4920_p6 = scmp.ne.s32.totalorder %s5518_s23, %s4919_s17  ;;  %p4925_p1 = scmp.lt.u32.totalorder %s5518_s23, %s6605_s5 }
  0x54   : > { %p4926_p3 = scmp.lt.u32.totalorder %s4924_s9, %s4919_s17  ;;  %p4928_p9 = scmp.lt.u32.totalorder %s4919_s17, %s5518_s23 }
  0x55   : > { %p4922_p10 = pnand %p4920_p6, %p5485_p8 }
  0x56   : > { %p4927_p7 = por %p4926_p3, %p4925_p1 }
  0x57   : > { %p4923_p13 = pneg %p4922_p10 }
  0x58   : > { %p4929_p11 = por %p4928_p9, %p4927_p7 }
  0x5a   : > { %p4930_p12 = pnand %p4929_p11, %p4923_p13 }
  0x5c   : > { %4933 = shalt.err (!%p4930_p12)
}
  0x5d   : > { %s4934_s10 = scalar_lea.vmem %s5527_s3, 1024  ;;  %s5262_s6 = smov [#allocation9]  }
  0x5e   : > { %p4935_p0 = scmp.ne.s32.totalorder %s5527_s3, %s4934_s10  ;;  %s4939_s19 = sshll.u32 %s5262_s6, 4  ;;  %s4940_s19 = int_to_ptr.vmem [resolvable:$false] %s4939_s19 }
  0x5f   : > { %s4941_s2 = scalar_lea.vmem %s4940_s19, 2048  ;;  %p4942_p10 = scmp.lt.s32.totalorder %s5527_s3, %s4940_s19 }
  0x60   : > { %p4937_p2 = pnand %p4935_p0, %p5485_p8  ;;  %p4943_p4 = scmp.lt.s32.totalorder %s4941_s2, %s4934_s10 }
  0x62   : > { %p4938_p6 = pneg %p4937_p2  ;;  %p4944_p1 = por %p4943_p4, %p4942_p10 }
  0x64   : > { %p4945_p3 = pnand %p4944_p1, %p4938_p6 }
  0x66   : > { %4948 = shalt.err (!%p4945_p3)
}
  0x67   : > { %s6609_s4 = smov 4   ;;  %s6610_s17 = smov 64  }
  0x68   : > { %4576 = dma.hbm_to_vmem [thread:$0]  (!%p5475_p5), %s5518_s23, 1024, %s5527_s3, %s6536_s8, %s6610_s17, %s6610_s17, %s6609_s4  }
  0x69   : > { %s6611_s9 = sand.u32 1, %s5225_s29   ;;  %s6537_s6 = sshll.u32 %s5249_s20, 12 }
  0x6a   : > { %s5558_s10 = sshll.u32 %s6611_s9, 8  ;;  %s6612_s11 = sld [smem:[#allocation56_spill]] }
  0x6b   : > { %s687_s7 = scalar_lea.vmem [#allocation12], %s5558_s10  ;;  %s6540_s3 = scalar_lea.sflag [#allocation13], %s5454_s1 }
  0x6c   : > { %s694_s15 = sshll.u32 %s687_s7, 4  ;;  %s5569_s15 = int_to_ptr.vmem [resolvable:$true] %s694_s15 }
  0x70   : > { %s5566_s5 = scalar_lea.hbm %s6612_s11, %s6537_s6  ;;  %s4954_s19 = scalar_lea.hbm %s6612_s11, 8192 }
  0x71   : > { %s4949_s23 = scalar_lea.hbm %s5566_s5, 4096  ;;  %p4955_p9 = scmp.lt.u32.totalorder %s5566_s5, %s6612_s11 }
  0x72   : > { %p4950_p4 = scmp.ne.s32.totalorder %s5566_s5, %s4949_s23  ;;  %p4956_p11 = scmp.lt.u32.totalorder %s4954_s19, %s4949_s23 }
  0x73   : > { %p4958_p0 = scmp.lt.u32.totalorder %s4949_s23, %s5566_s5 }
  0x74   : > { %p4952_p13 = pnand %p4950_p4, %p5485_p8  ;;  %p4957_p12 = por %p4956_p11, %p4955_p9 }
  0x76   : > { %p4953_p7 = pneg %p4952_p13  ;;  %p4959_p2 = por %p4958_p0, %p4957_p12 }
  0x78   : > { %p4960_p6 = pnand %p4959_p2, %p4953_p7 }
  0x7a   : > { %4963 = shalt.err (!%p4960_p6)
}
  0x7b   : > { %s4964_s7 = scalar_lea.vmem %s5569_s15, 4096  ;;  %s5263_s8 = smov [#allocation12]  }
  0x7c   : > { %p4965_p10 = scmp.ne.s32.totalorder %s5569_s15, %s4964_s7  ;;  %s4969_s9 = sshll.u32 %s5263_s8, 4  ;;  %s4970_s9 = int_to_ptr.vmem [resolvable:$false] %s4969_s9 }
  0x7d   : > { %s4971_s6 = scalar_lea.vmem %s4970_s9, 8192  ;;  %p4972_p4 = scmp.lt.s32.totalorder %s5569_s15, %s4970_s9 }
  0x7e   : > { %p4967_p1 = pnand %p4965_p10, %p5485_p8  ;;  %p4973_p13 = scmp.lt.s32.totalorder %s4971_s6, %s4964_s7 }
  0x80   : > { %p4968_p3 = pneg %p4967_p1  ;;  %p4974_p9 = por %p4973_p13, %p4972_p4 }
  0x82   : > { %p4975_p11 = pnand %p4974_p9, %p4968_p3 }
  0x84   : > { %4978 = shalt.err (!%p4975_p11)
}
  0x85   : > { %s5264_s23 = smov 256   ;;  %s5265_s19 = smov 16  }
  0x86   : > { %4582 = dma.hbm_to_vmem [thread:$0]  (!%p5475_p5), %s5566_s5, 4096, %s5569_s15, %s6540_s3, %s5264_s23, %s5264_s23, %s5265_s19  }
  0x87   : > { %s6613_s2 = sshll.u32 %s5249_s20, 12  ;;  %s6614_s13 = sld [smem:[#allocation58_spill]] }
  0x88   : > { %s715_s6 = scalar_lea.vmem [#allocation14], %s5558_s10  ;;  %s5606_s17 = sadd.s32 4294967295, %s5257_s22  }
  0x89   : > { %s722_s11 = sshll.u32 %s715_s6, 4  ;;  %s4147_s4 = sadd.s32 4294967294, %s5257_s22   ;;  %s5603_s11 = int_to_ptr.vmem [resolvable:$true] %s722_s11 }
  0x8a   : > { %s6615_s14 = sadd.s32 1, %s5249_s20  ;;  %s54_s5 = sadd.s32 1, %s5253_s21 }
  0x8b   : > { %p52_p7 = scmp.ge.s32.totalorder %s6615_s14, 2  ;;  %s61_s15 = sadd.s32 1, %s5237_s18 }
  0x8c   : > { %p68_p12 = scmp.ne.s32.totalorder %s5237_s18, %s5233_s30  ;;  %s6616_s23 = smov %s6615_s14 }
  0x8d   : > { %s5600_s9 = scalar_lea.hbm %s6614_s13, %s6613_s2  ;;  %s6706_s23 = smov (%p52_p7, %s6616_s23), 0 }
  0x8e   : > { %6617 = sst [smem:[#allocation36_spill]] %s6706_s23  ;;  %s6708_s5 = smov (!%p52_p7, %s54_s5), %s5253_s21 }
  0x8f   : > { %p6618_p0 = scmp.eq.s32.totalorder %s5257_s22, 0  ;;  %p74_p6 = scmp.ne.s32.totalorder %s5233_s30, %s5229_s0 }
  0x90   : > { %p56_p10 = scmp.ge.s32.totalorder %s6708_s5, 2  ;;  %p75_p1 = scmp.eq.s32.totalorder %s5606_s17, 0 }
  0x91   : > { %p5622_p2 = por %p6618_p0, %p68_p12  ;;  %s84_s14 = ssub.s32 %s5249_s20, %s6706_s23 }
  0x92   : > { %s505_s19 = sadd.s32 1, %s5213_s26  ;;  %s6710_s5 = smov (%p56_p10, %s6708_s5), 0 }
  0x93   : > { %6620 = sst [smem:[#allocation37_spill]] %s6710_s5  ;;  %p5634_p3 = por %p75_p1, %p74_p6 }
  0x94   : > { %p85_p4 = scmp.eq.s32.totalorder %s84_s14, 0  ;;  %s58_s7 = ssub.s32 %s5253_s21, %s6710_s5 }
  0x95   : > { %s6621_s2 = scalar_select %p5634_p3, 1, 0 }
  0x96   : > { %p6622_p13 = scmp.ne.s32.totalorder %s5221_s28, %s5217_s27  ;;  %p59_p11 = scmp.eq.s32.totalorder %s58_s7, 0 }
  0x97   : > { %s502_s8 = sor.u32 %s84_s14, %s58_s7  ;;  %s6625_s6 = sadd.s32 1, %s5225_s29 }
  0x98   : > { %p5643_p9 = por %p6622_p13, %p75_p1  ;;  %p503_p7 = scmp.eq.s32.totalorder %s502_s8, 0 }
  0x99   : > { %s5650_s3 = scalar_select %p85_p4, %s5225_s29, %s6625_s6  }
  0x9a   : > { %s6623_s0 = scalar_select %p5643_p9, 1, 0 }
  0x9b   : > { %6626 = sst [smem:[#allocation39_spill]] %s5650_s3  ;;  %p515_p12 = scmp.ne.s32.totalorder %s5213_s26, %s5209_s25 }
  0x9c   : > { %6624 = sst [smem:[#allocation38_spill]] %s6623_s0  ;;  %p516_p0 = scmp.eq.s32.totalorder %s5606_s17, 3 }
  0x9d   : > { %s5653_s23 = scalar_select %p59_p11, %s5237_s18, %s61_s15  }
  0x9e   : > { %p521_p6 = scmp.ne.s32.totalorder %s5209_s25, %s5205_s24  ;;  %p5663_p10 = por %p516_p0, %p515_p12 }
  0x9f   : > { %6627 = sst [smem:[#allocation40_spill]] %s5653_s23  ;;  %p522_p1 = scmp.eq.s32.totalorder %s4147_s4, 3 }
  0xa0   : > { %s5661_s20 = scalar_select %p503_p7, %s5213_s26, %s505_s19  }
  0xa1   : > { %s6629_s27 = scalar_select %p5663_p10, 1, 0 }
  0xa2   : > { %6628 = sst [smem:[#allocation41_spill]] %s5661_s20  ;;  %s542_s5 = sand.u32 1, %s5237_s18  }
  0xa3   : > { %6630 = sst [smem:[#allocation42_spill]] %s6629_s27  ;;  %s4317_s0 = sshll.u32 %s5253_s21, 8 }
  0xa4   : > { %p5669_p13 = por %p522_p1, %p521_p6  ;;  %s4150_s7 = sshll.u32 %s542_s5, 4 }
  0xa5   : > { %s6633_s8 = sld [smem:[#allocation45_spill]]  ;;  %p6634_p4 = scmp.lt.s32.totalorder %s5257_s22, 4 }
  0xa6   : > { %s6631_s14 = scalar_select %p5669_p13, 1, 0 }
  0xa7   : > { %p5682_p11 = pnand %p6634_p4, %p5622_p2  ;;  %s546_s19 = scalar_lea.vmem [#allocation3], %s4150_s7 }
  0xa8   : > { %6632 = sst [smem:[#allocation43_spill]] %s6631_s14  ;;  %s553_s21 = sshll.u32 %s546_s19, 4  ;;  %s5686_s21 = int_to_ptr.vmem [resolvable:$true] %s553_s21 }
  0xa9   : > { %s5688_s18 = scalar_lea.sflag [#allocation4], %s542_s5  ;;  %p4981_p12 = pneg %p5682_p11 }
  0xab   : > { %s5676_s23 = scalar_lea.hbm %s6633_s8, %s4317_s0  ;;  %s4984_s6 = scalar_lea.hbm %s6633_s8, 512 }
  0xac   : > { %s4979_s0 = scalar_lea.hbm %s5676_s23, 256  ;;  %p4985_p2 = scmp.lt.u32.totalorder %s5676_s23, %s6633_s8 }
  0xad   : > { %p4980_p7 = scmp.ne.s32.totalorder %s5676_s23, %s4979_s0  ;;  %p4986_p1 = scmp.lt.u32.totalorder %s4984_s6, %s4979_s0 }
  0xae   : > { %p4988_p13 = scmp.lt.u32.totalorder %s4979_s0, %s5676_s23 }
  0xaf   : > { %p4982_p0 = pnand %p4981_p12, %p4980_p7  ;;  %p4987_p4 = por %p4986_p1, %p4985_p2 }
  0xb1   : > { %p4983_p6 = pneg %p4982_p0  ;;  %p4989_p10 = por %p4988_p13, %p4987_p4 }
  0xb3   : > { %p4990_p9 = pnand %p4989_p10, %p4983_p6 }
  0xb5   : > { %4993 = shalt.err (!%p4990_p9)
}
  0xb6   : > { %s4994_s5 = scalar_lea.vmem %s5686_s21, 256  ;;  %s5266_s7 = smov [#allocation3]  }
  0xb7   : > { %p4995_p7 = scmp.ne.s32.totalorder %s5686_s21, %s4994_s5  ;;  %s4999_s19 = sshll.u32 %s5266_s7, 4  ;;  %s5000_s19 = int_to_ptr.vmem [resolvable:$false] %s4999_s19 }
  0xb8   : > { %s5001_s29 = scalar_lea.vmem %s5000_s19, 512  ;;  %p5002_p5 = scmp.lt.s32.totalorder %s5686_s21, %s5000_s19 }
  0xb9   : > { %p4997_p0 = pnand %p4995_p7, %p4981_p12  ;;  %p5003_p2 = scmp.lt.s32.totalorder %s5001_s29, %s4994_s5 }
  0xbb   : > { %p4998_p3 = pneg %p4997_p0  ;;  %p5004_p1 = por %p5003_p2, %p5002_p5 }
  0xbd   : > { %p5005_p13 = pnand %p5004_p1, %p4998_p3 }
  0xbf   : > { %5008 = shalt.err (!%p5005_p13)
}
  0xc0   : > { %s5267_s3 = smov 128   ;;  %s6636_s0 = sld [smem:[#allocation33_spill]] }
  0xc1   : > { %s5268_s15 = smov 8   ;;  %s6638_s8 = sld [smem:[#allocation48_spill]] }
  0xc2   : > { %4567 = dma.hbm_to_vmem [thread:$0]  (!%p5682_p11), %s5676_s23, 256, %s5686_s21, %s5688_s18, %s5267_s3, %s5267_s3, %s5268_s15  }
  0xc6   : > { %s594_s5 = scalar_lea.vmem [#allocation8], %s6636_s0 }
  0xc7   : > { %s5720_s20 = scalar_lea.hbm %s6638_s8, %s5462_s12  ;;  %s601_s19 = sshll.u32 %s594_s5, 4  ;;  %s5723_s19 = int_to_ptr.vmem [resolvable:$true] %s601_s19 }
  0xc8   : > { %s5009_s29 = scalar_lea.hbm %s5720_s20, 1024  ;;  %s5014_s21 = scalar_lea.hbm %s6638_s8, 2048 }
  0xc9   : > { %p5010_p5 = scmp.ne.s32.totalorder %s5720_s20, %s5009_s29  ;;  %p5015_p10 = scmp.lt.u32.totalorder %s5720_s20, %s6638_s8 }
  0xca   : > { %p5016_p11 = scmp.lt.u32.totalorder %s5014_s21, %s5009_s29  ;;  %p5018_p6 = scmp.lt.u32.totalorder %s5009_s29, %s5720_s20 }
  0xcb   : > { %p5012_p3 = pnand %p5010_p5, %p5485_p8 }
  0xcc   : > { %p5017_p12 = por %p5016_p11, %p5015_p10 }
  0xcd   : > { %p5013_p9 = pneg %p5012_p3 }
  0xce   : > { %p5019_p4 = por %p5018_p6, %p5017_p12 }
  0xd0   : > { %p5020_p7 = pnand %p5019_p4, %p5013_p9 }
  0xd2   : > { %5023 = shalt.err (!%p5020_p7)
}
  0xd3   : > { %s5024_s15 = scalar_lea.vmem %s5723_s19, 1024  ;;  %s5269_s6 = smov [#allocation8]  }
  0xd4   : > { %p5025_p0 = scmp.ne.s32.totalorder %s5723_s19, %s5024_s15  ;;  %s5029_s7 = sshll.u32 %s5269_s6, 4  ;;  %s5030_s7 = int_to_ptr.vmem [resolvable:$false] %s5029_s7 }
  0xd5   : > { %s5031_s5 = scalar_lea.vmem %s5030_s7, 2048  ;;  %p5032_p13 = scmp.lt.s32.totalorder %s5723_s19, %s5030_s7 }
  0xd6   : > { %p5027_p2 = pnand %p5025_p0, %p5485_p8  ;;  %p5033_p5 = scmp.lt.s32.totalorder %s5031_s5, %s5024_s15 }
  0xd8   : > { %p5028_p1 = pneg %p5027_p2  ;;  %p5034_p3 = por %p5033_p5, %p5032_p13 }
  0xda   : > { %p5035_p10 = pnand %p5034_p3, %p5028_p1 }
  0xdc   : > { %5038 = shalt.err (!%p5035_p10)
}
  0xdd   : > { %p6639_p9 = scmp.ne.s32.totalorder %s6601_s16, 0  ;;  %s6640_s29 = smov 4  }
  0xde   : > { %s6641_s4 = smov 64   ;;  %s6642_s18 = scalar_lea.sflag [#allocation7], %s5454_s1 }
  0xdf   : > { %4573 = dma.hbm_to_vmem [thread:$0]  (!%p6639_p9), %s5720_s20, 1024, %s5723_s19, %s6642_s18, %s6641_s4, %s6641_s4, %s6640_s29  }
  0xe0   : > { %s6643_s3 = sld [smem:[#allocation52_spill]]  ;;  %s648_s6 = scalar_lea.vmem [#allocation11], %s6636_s0 }
  0xe1   : > { %s655_s7 = sshll.u32 %s648_s6, 4  ;;  %s5758_s7 = int_to_ptr.vmem [resolvable:$true] %s655_s7 }
  0xe6   : > { %s5755_s15 = scalar_lea.hbm %s6643_s3, %s5462_s12  ;;  %s5044_s19 = scalar_lea.hbm %s6643_s3, 2048 }
  0xe7   : > { %s5039_s5 = scalar_lea.hbm %s5755_s15, 1024  ;;  %p5045_p4 = scmp.lt.u32.totalorder %s5755_s15, %s6643_s3 }
  0xe8   : > { %p5040_p11 = scmp.ne.s32.totalorder %s5755_s15, %s5039_s5  ;;  %p5046_p7 = scmp.lt.u32.totalorder %s5044_s19, %s5039_s5 }
  0xe9   : > { %p5048_p2 = scmp.lt.u32.totalorder %s5039_s5, %s5755_s15 }
  0xea   : > { %p5042_p12 = pnand %p5040_p11, %p5485_p8  ;;  %p5047_p0 = por %p5046_p7, %p5045_p4 }
  0xec   : > { %p5043_p6 = pneg %p5042_p12  ;;  %p5049_p1 = por %p5048_p2, %p5047_p0 }
  0xee   : > { %p5050_p13 = pnand %p5049_p1, %p5043_p6 }
  0xf0   : > { %5053 = shalt.err (!%p5050_p13)
}
  0xf1   : > { %s5054_s0 = scalar_lea.vmem %s5758_s7, 1024  ;;  %s5270_s8 = smov [#allocation11]  }
  0xf2   : > { %p5055_p5 = scmp.ne.s32.totalorder %s5758_s7, %s5054_s0  ;;  %s5059_s21 = sshll.u32 %s5270_s8, 4  ;;  %s5060_s21 = int_to_ptr.vmem [resolvable:$false] %s5059_s21 }
  0xf3   : > { %s5061_s23 = scalar_lea.vmem %s5060_s21, 2048  ;;  %p5062_p11 = scmp.lt.s32.totalorder %s5758_s7, %s5060_s21 }
  0xf4   : > { %p5057_p3 = pnand %p5055_p5, %p5485_p8  ;;  %p5063_p12 = scmp.lt.s32.totalorder %s5061_s23, %s5054_s0 }
  0xf6   : > { %p5058_p10 = pneg %p5057_p3  ;;  %p5064_p4 = por %p5063_p12, %p5062_p11 }
  0xf8   : > { %p5065_p7 = pnand %p5064_p4, %p5058_p10 }
  0xfa   : > { %5068 = shalt.err (!%p5065_p7)
}
  0xfb   : > { %s6644_s6 = scalar_lea.sflag [#allocation10], %s5454_s1  ;;  %s5069_s5 = scalar_lea.hbm %s5600_s9, 4096 }
  0xfc   : > { %4579 = dma.hbm_to_vmem [thread:$0]  (!%p6639_p9), %s5755_s15, 1024, %s5758_s7, %s6644_s6, %s6641_s4, %s6641_s4, %s6640_s29  }
  0xfd   : > { %p5070_p6 = scmp.ne.s32.totalorder %s5600_s9, %s5069_s5  ;;  %s5074_s18 = scalar_lea.hbm %s6614_s13, 8192 }
  0xfe   : > { %p5075_p1 = scmp.lt.u32.totalorder %s5600_s9, %s6614_s13  ;;  %p5076_p13 = scmp.lt.u32.totalorder %s5074_s18, %s5069_s5 }
  0xff   : > { %p5072_p0 = pnand %p5070_p6, %p5485_p8  ;;  %p5078_p3 = scmp.lt.u32.totalorder %s5069_s5, %s5600_s9 }
 0x100   : > { %p5077_p5 = por %p5076_p13, %p5075_p1 }
 0x101   : > { %p5073_p2 = pneg %p5072_p0 }
 0x102   : > { %p5079_p10 = por %p5078_p3, %p5077_p5 }
 0x104   : > { %p5080_p11 = pnand %p5079_p10, %p5073_p2 }
 0x106   : > { %5083 = shalt.err (!%p5080_p11)
}
 0x107   : > { %s5084_s15 = scalar_lea.vmem %s5603_s11, 4096  ;;  %s5271_s7 = smov [#allocation14]  }
 0x108   : > { %p5085_p12 = scmp.ne.s32.totalorder %s5603_s11, %s5084_s15  ;;  %s5089_s8 = sshll.u32 %s5271_s7, 4  ;;  %s5090_s8 = int_to_ptr.vmem [resolvable:$false] %s5089_s8 }
 0x109   : > { %s5091_s21 = scalar_lea.vmem %s5090_s8, 8192  ;;  %p5092_p6 = scmp.lt.s32.totalorder %s5603_s11, %s5090_s8 }
 0x10a   : > { %p5087_p4 = pnand %p5085_p12, %p5485_p8  ;;  %p5093_p0 = scmp.lt.s32.totalorder %s5091_s21, %s5084_s15 }
 0x10c   : > { %p5088_p7 = pneg %p5087_p4  ;;  %p5094_p1 = por %p5093_p0, %p5092_p6 }
 0x10e   : > { %p5095_p13 = pnand %p5094_p1, %p5088_p7 }
 0x110   : > { %5098 = shalt.err (!%p5095_p13)
}
 0x111   : > { %s6645_s23 = scalar_lea.sflag [#allocation13], %s5454_s1  ;;  %s6646_s10 = sld [smem:[#allocation35_spill]] }
 0x112   : > { %4585 = dma.hbm_to_vmem [thread:$0]  (!%p6639_p9), %s5600_s9, 4096, %s5603_s11, %s6645_s23, %s6641_s4, %s6641_s4, %s6640_s29  }
 0x117   : > { %p6647_p8 = scmp.ne.s32.totalorder %s6646_s10, 0 }
 0x119   : > { %752 = sbr.rel (%p6647_p8) target bundleno = 3001 (0xbb9), region = 88 }
 0x120   : > { %s754_s6 = sand.u32 1, %s5233_s30   ;;  %p6648_p2 = scmp.ne.s32.totalorder %s6621_s2, 0 }
 0x121   : > { %s5815_s5 = sshll.u32 %s754_s6, 4  ;;  %s755_s20 = scalar_lea.sflag [#allocation4], %s754_s6 }
 0x122   : > { %5184 = dma.done.wait (%p6648_p2), %s755_s20, 256  }
 0x123   : > { %5186 = vsyncadd (%p6648_p2), %s755_s20, 4294967040  ;;  %s6649_s16 = sld [smem:[#allocation38_spill]]  ;;  %s763_s11 = sand.u32 1, %s5606_s17  }
 0x124   : > { %s765_s1 = sand.u32 1, %s5221_s28   ;;  %s764_s29 = scalar_lea.sflag [#allocation7], %s763_s11 }
 0x125   : > { %s4173_s9 = sshll.u32 %s765_s1, 6 }
 0x126   : > { %s5824_s4 = scalar_lea.vmem [#allocation6], %s4173_s9 }
 0x129   : > { %p6650_p9 = scmp.ne.s32.totalorder %s6649_s16, 0 }
 0x12b   : > { %5188 = dma.done.wait (%p6650_p9), %s764_s29, 2048  }
 0x12c   : > { %5190 = vsyncadd (%p6650_p9), %s764_s29, 4294965248  ;;  %s5830_s18 = scalar_lea.vmem [#allocation8], %s4173_s9  ;;  %s782_s12 = scalar_lea.sflag [#allocation10], %s763_s11 }
 0x12d   : > { %s5832_s2 = scalar_lea.vmem [#allocation9], %s4173_s9 }
 0x12e   : > { %5192 = dma.done.wait (%p6650_p9), %s782_s12, 2048  }
 0x12f   : > { %5194 = vsyncadd (%p6650_p9), %s782_s12, 4294965248  ;;  %s4177_s17 = sshll.u32 %s765_s1, 8  ;;  %s5838_s0 = scalar_lea.vmem [#allocation11], %s4173_s9 }
 0x130   : > { %s800_s15 = scalar_lea.sflag [#allocation13], %s763_s11  ;;  %s5840_s7 = scalar_lea.vmem [#allocation12], %s4177_s17 }
 0x131   : > { %6651 = sst [smem:[#allocation44_spill]] %s5840_s7 }
 0x132   : > { %5196 = dma.done.wait (%p6650_p9), %s800_s15, 8192  }
 0x133   : > { %5198 = vsyncadd (%p6650_p9), %s800_s15, 4294959104  ;;  %s6652_s8 = sld [smem:[#allocation28_spill]]  ;;  %s6556_s21 = sand.u32 1, %s5209_s25  }
 0x134   : > { %s4179_s23 = sshll.u32 %s6556_s21, 4  ;;  %s6655_s19 = sld [smem:[#allocation51_spill]] }
 0x135   : > { %s6658_s25 = sld [smem:[#allocation55_spill]]  ;;  %s6659_s9 = sld [smem:[#allocation59_spill]] }
 0x136   : > { %s6661_s20 = sld [smem:[#allocation60_spill]]  ;;  %s6662_s14 = sld [smem:[#allocation61_spill]] }
 0x137   : > { %s5895_s22 = scalar_lea.vmem [#allocation14], %s4177_s17 }
 0x139   : > { %p924_p5 = scmp.lt.s32.totalorder %s6652_s8, 1  ;;  %p4181_p3 = scmp.ne.s32.totalorder %s6652_s8, 0 }
 0x13a   : > { %s6663_s27 = scalar_lea.vmem (!%p4181_p3), [#allocation3], %s5815_s5 }
 0x13b   : > { %s5851_s10 = scalar_select %p924_p5, %s6652_s8, 1 }
 0x13c   : > { %v960_v0 = vld [vmem:[%s6663_s27] sm:$0xff] (!%p4181_p3)  ;;  %s6664_s7 = smov (!%p4181_p3), %s6663_s27 }
 0x13d   : > { %s932_s3 = scalar_lea.vmem %s6655_s19, %s5851_s10  ;;  %s941_s11 = scalar_lea.vmem %s6658_s25, %s5851_s10  ;;  %v961_v1 = vld [vmem:[%s6664_s7 + $0x8] sm:$0xff] (!%p4181_p3)  ;;  %962 = vst [vmem:[#allocation2] sm:$0xff] (!%p4181_p3), %v960_v0 }
 0x13e   : > { %s4180_s16 = sshll.u32 %s5851_s10, 2  ;;  %s948_s29 = scalar_lea.vmem %s6659_s9, %s5851_s10  ;;  %963 = vst [vmem:[#allocation2 + $0x8] sm:$0xff] (!%p4181_p3), %v961_v1 }
 0x13f   : > { %s6660_s19 = sld [smem:[#allocation57_spill]]  ;;  %s951_s30 = scalar_lea.vmem %s6661_s20, %s5851_s10 }
 0x140   : > { %s954_s24 = scalar_lea.vmem %s6662_s14, %s5851_s10  ;;  %s5897_s25 = scalar_lea.vmem [#allocation15], %s4179_s23 }
 0x141   : > { %959 = sbr.rel (%p4181_p3) target bundleno = 328 (0x148), region = 120 }
 0x145   : > { %s5885_s15 = scalar_lea.vmem %s6660_s19, %s4180_s16 }
 0x148 PF: > { %v4735_v2 = vld [vmem:[%s5830_s18] sm:$0xff]   ;;  %v5272_v3 = vmov 0.0   ;;  %v4736_v4 = vld [vmem:[%s5830_s18 + $0x8] sm:$0xff]   ;;  %vm5273_vm0 = vmmov 0   ;;  %v4738_v7 = vld [vmem:[%s5830_s18 + $0x10] sm:$0xff]   ;;  %s5274_s8 = smov 64   ;;  %v1328_v46 = vlaneseq }
 0x149   : > { %4440 = vmatprep.subr.bf16.mxu1 %v5272_v3  ;;  %4420 = vmatprep.subr.bf16.mxu0 %v5272_v3  ;;  %v4737_v5 = vld [vmem:[%s5824_s4] sm:$0xff]   ;;  %v4739_v6 = vld [vmem:[%s5824_s4 + $0x8] sm:$0xff]   ;;  %v4741_v8 = vld [vmem:[%s5824_s4 + $0x10] sm:$0xff]   ;;  %s6667_s12 = sld [smem:[#allocation47_spill]]  ;;  %s5276_s9 = smov 32   ;;  %vm2191_vm1 = vcmask 261120  }
 0x14a   : > { %4441 = vmatpush3.bf16.msra.mxu1 %v4735_v2  ;;  %4456 = vmatprep.mubr.msk.bf16.mxu1 %vm5273_vm0, %v5272_v3  ;;  %v4740_v9 = vld [vmem:[%s5830_s18 + $0x18] sm:$0xff]   ;;  %v4742_v11 = vld [vmem:[%s5830_s18 + $0x20] sm:$0xff]   ;;  %v4744_v12 = vld [vmem:[%s5830_s18 + $0x28] sm:$0xff]   ;;  %v5277_v44 = vmov 1983009808   ;;  %v5996_v50 = vshrl.u32 %v1328_v46, 7 }
 0x14b   : > { %4442 = vmatprep.subr.bf16.mxu1 %v5272_v3  ;;  %4436 = vmatprep.mubr.msk.bf16.mxu0 %vm5273_vm0, %v5272_v3  ;;  %v4743_v10 = vld [vmem:[%s5824_s4 + $0x18] sm:$0xff]   ;;  %v4745_v13 = vld [vmem:[%s5824_s4 + $0x20] sm:$0xff]   ;;  %v4747_v14 = vld [vmem:[%s5824_s4 + $0x28] sm:$0xff]   ;;  %v1326_v45 = vunpack.c.l.s4 %v5277_v44  ;;  %v5278_v47 = vmov 1934713408   ;;  %vm2388_vm2 = vcmask 130048  }
 0x14c   : > { %4421 = vmatpush3.bf16.msra.mxu0 %v4737_v5  ;;  %v4746_v15 = vld [vmem:[%s5830_s18 + $0x30] sm:$0xff]   ;;  %v4748_v17 = vld [vmem:[%s5830_s18 + $0x38] sm:$0xff]   ;;  %v4751_v22 = vld [vmem:[%s5832_s2] sm:$0xff]   ;;  %s6665_s18 = sld [smem:[#allocation49_spill]]  ;;  %v1358_v48 = vunpack.c.l.s4 %v5278_v47  ;;  %vm2955_vm3 = vcmask 523264   ;;  %vm2958_vm4 = vcmask 785408  }
 0x14d   : > { %4422 = vmatprep.subr.bf16.mxu0 %v5272_v3  ;;  %v4749_v16 = vld [vmem:[%s5824_s4 + $0x30] sm:$0xff]   ;;  %v965_v19 = vld [vmem:[#allocation2 + $0x8] sm:$0xff]  ;;  %v4752_v23 = vld [vmem:[%s5832_s2 + $0x8] sm:$0xff]   ;;  %v1327_v49 = vunpack.c.0.s8 %v1326_v45  ;;  %s6671_s20 = sld [smem:[#allocation53_spill]]  ;;  %s6673_s27 = sld [smem:[#allocation54_spill]] }
 0x14e   : > { %4443 = vmatpush3.bf16.msra.mxu1 %v4736_v4  ;;  %v964_v18 = vld [vmem:[#allocation2] sm:$0xff]  ;;  %v4750_v20 = vld [vmem:[%s5824_s4 + $0x38] sm:$0xff]   ;;  %v4755_v26 = vld [vmem:[%s5832_s2 + $0x20] sm:$0xff]   ;;  %v1359_v53 = vunpack.c.0.s8 %v1358_v48 }
 0x14f   : > { %4444 = vmatprep.subr.bf16.mxu1 %v5272_v3  ;;  %v966_v21 = vpack.c.bf16 %v965_v19, %v964_v18  ;;  %v4753_v24 = vld [vmem:[%s5832_s2 + $0x10] sm:$0xff]   ;;  %v4754_v25 = vld [vmem:[%s5832_s2 + $0x18] sm:$0xff]   ;;  %v4756_v27 = vld [vmem:[%s5832_s2 + $0x28] sm:$0xff]   ;;  %s6668_s1 = scalar_lea.vmem %s6667_s12, %s5851_s10  ;;  %v5999_v54 = vsub.s32 %v1327_v49, %v5996_v50 }
 0x150   : > { %4423 = vmatpush3.bf16.msra.mxu0 %v4739_v6  ;;  %v4757_v28 = vld [vmem:[%s5832_s2 + $0x30] sm:$0xff]   ;;  %v4758_v29 = vld [vmem:[%s5832_s2 + $0x38] sm:$0xff]   ;;  %s5275_s2 = smov 96   ;;  %v6002_v61 = vsub.s32 %v1359_v53, %v5996_v50 }
 0x151   : > { %4424 = vmatprep.subr.bf16.mxu0 %v5272_v3  ;;  %v4182_v38 = vld [vmem:[%s6668_s1] ss:$0 sm:$0xff] }
 0x152   : > { %4445 = vmatpush3.bf16.msra.mxu1 %v4738_v7  ;;  %s6666_s17 = scalar_lea.vmem %s6665_s18, %s5851_s10 }
 0x153   : > { %4446 = vmatprep.subr.bf16.mxu1 %v5272_v3  ;;  %v4191_v30 = vld [vmem:[%s6666_s17] ss:$0 sm:$0xff]  ;;  %s6672_s26 = scalar_lea.vmem %s6671_s20, %s5851_s10  ;;  %s6674_s7 = scalar_lea.vmem %s6673_s27, %s5851_s10 }
 0x154   : > { %4425 = vmatpush3.bf16.msra.mxu0 %v4741_v8  ;;  %s6678_s17 = sld [smem:[#allocation29_spill]] }
 0x155   : > { %4426 = vmatprep.subr.bf16.mxu0 %v5272_v3 }
 0x156   : > { %4447 = vmatpush3.bf16.msra.mxu1 %v4740_v9 }
 0x157   : > { %4448 = vmatprep.subr.bf16.mxu1 %v5272_v3 }
 0x158   : > { %4427 = vmatpush3.bf16.msra.mxu0 %v4743_v10 }
 0x159   : > { %4428 = vmatprep.subr.bf16.mxu0 %v5272_v3 }
 0x15a   : > { %4449 = vmatpush3.bf16.msra.mxu1 %v4742_v11 }
 0x15b   : > { %4450 = vmatprep.subr.bf16.mxu1 %v5272_v3 }
 0x15c   : > { %4429 = vmatpush3.bf16.msra.mxu0 %v4745_v13 }
 0x15d   : > { %4430 = vmatprep.subr.bf16.mxu0 %v5272_v3 }
 0x15e   : > { %4451 = vmatpush3.bf16.msra.mxu1 %v4744_v12 }
 0x15f   : > { %4452 = vmatprep.subr.bf16.mxu1 %v5272_v3 }
 0x160   : > { %4431 = vmatpush3.bf16.msra.mxu0 %v4747_v14 }
 0x161   : > { %4432 = vmatprep.subr.bf16.mxu0 %v5272_v3 }
 0x162   : > { %4453 = vmatpush3.bf16.msra.mxu1 %v4746_v15 }
 0x163   : > { %4454 = vmatprep.subr.bf16.mxu1 %v5272_v3 }
 0x164   : > { %4433 = vmatpush3.bf16.msra.mxu0 %v4749_v16 }
 0x165   : > { %4434 = vmatprep.subr.bf16.mxu0 %v5272_v3 }
 0x166   : > { %4455 = vmatpush3.bf16.msra.mxu1 %v4748_v17 }
 0x167   : > { %4480 = vmatprep.subr.bf16.mxu1 %v5272_v3 }
 0x168   : > { %4435 = vmatpush3.bf16.msra.mxu0 %v4750_v20 }
 0x169   : > { %4457 = vmatmul.mubr.bf16.vlgmr.msra.gmra.mrb[0].mxu1 %v966_v21  ;;  %4460 = vmatprep.subr.bf16.mxu0 %v5272_v3 }
 0x16a   : > { %4482 = vmatprep.mubr.msk.bf16.mxu1 %vm5273_vm0, %v5272_v3 }
 0x16b   : > { %4437 = vmatmul.mubr.bf16.vlgmr.msra.gmra.mrb[0].mxu0 %v966_v21 }
 0x16c   : > { %4476 = vmatprep.mubr.msk.bf16.mxu0 %vm5273_vm0, %v5272_v3  ;;  %4461 = vmatpush3.bf16.msra.mxu0 %v4751_v22 }
 0x16d   : > { %4462 = vmatprep.subr.bf16.mxu0 %v5272_v3 }
 0x170   : > { %4463 = vmatpush3.bf16.msra.mxu0 %v4752_v23 }
 0x171   : > { %4464 = vmatprep.subr.bf16.mxu0 %v5272_v3 }
 0x174   : > { %4465 = vmatpush3.bf16.msra.mxu0 %v4753_v24 }
 0x175   : > { %4466 = vmatprep.subr.bf16.mxu0 %v5272_v3 }
 0x178   : > { %4467 = vmatpush3.bf16.msra.mxu0 %v4754_v25 }
 0x179   : > { %4468 = vmatprep.subr.bf16.mxu0 %v5272_v3 }
 0x17c   : > { %4469 = vmatpush3.bf16.msra.mxu0 %v4755_v26 }
 0x17d   : > { %4470 = vmatprep.subr.bf16.mxu0 %v5272_v3 }
 0x180   : > { %4471 = vmatpush3.bf16.msra.mxu0 %v4756_v27 }
 0x181   : > { %4472 = vmatprep.subr.bf16.mxu0 %v5272_v3 }
 0x184   : > { %4473 = vmatpush3.bf16.msra.mxu0 %v4757_v28 }
 0x185   : > { %4474 = vmatprep.subr.bf16.mxu0 %v5272_v3 }
 0x188   : > { %4475 = vmatpush3.bf16.msra.mxu0 %v4758_v29 }
 0x189   : > { %4528 = vmatprep.subr.bf16.mxu0 %v5272_v3 }
 0x18b   : > { %4477 = vmatmul.mubr.bf16.vlgmr.msra.gmra.mrb[4].mxu0 %v966_v21 }
 0x18c   : > { %4544 = vmatprep.mubr.msk.bf16.mxu0 %vm5273_vm0, %v5272_v3 }
 0x23c   : > { %v1184_v31 = vpop.f32.mrb[0].mxu1 }
 0x23d   : > { %v1185_v32 = vadd.f32 %v4191_v30, %v1184_v31  ;;  %v4458_v33 = vpop.f32.mrb[1].mxu1 }
 0x23e   : > { %v1187_v34 = vpop.f32.mrb[2].mxu1  ;;  %v1072_v35 = vpop.f32.mrb[0].mxu0 }
 0x23f   : > { %1607 = vrot.lane.b32.xlu1 %v1185_v32, %s5274_s8  ;;  %1601 = vrot.lane.b32.xlu0 %v1185_v32, %s5275_s2  ;;  %v4459_v36 = vpop.f32.mrb[3].mxu1  ;;  %v4438_v37 = vpop.f32.mrb[1].mxu0  ;;  %v1188_v40 = vadd.f32 %v4191_v30, %v1187_v34  ;;  %v5976_v42 = vadd.f32 %v4182_v38, %v1072_v35 }
 0x240   : > { %v1075_v39 = vpop.f32.mrb[2].mxu0 }
 0x241   : > { %v4439_v41 = vpop.f32.mrb[3].mxu0  ;;  %v5983_v43 = vadd.f32 %v4182_v38, %v1075_v39 }
 0x243   : > { %1613 = vrot.lane.b32.xlu0 %v1185_v32, %s5276_s9  ;;  %1609 = vrot.lane.b32.xlu1 %v1188_v40, %s5274_s8 }
 0x247   : > { %1615 = vrot.lane.b32.xlu1 %v1188_v40, %s5276_s9  ;;  %1305 = vrot.lane.b32.xlu0 %v5976_v42, %s5275_s2 }
 0x24b   : > { %1603 = vrot.lane.b32.xlu0 %v1188_v40, %s5275_s2  ;;  %1307 = vrot.lane.b32.xlu1 %v5983_v43, %s5275_s2 }
 0x24f   : > { %1311 = vrot.lane.b32.xlu0 %v5976_v42, %s5274_s8  ;;  %1313 = vrot.lane.b32.xlu1 %v5983_v43, %s5274_s8 }
 0x253   : > { %1317 = vrot.lane.b32.xlu0 %v5976_v42, %s5276_s9  ;;  %1319 = vrot.lane.b32.xlu1 %v5983_v43, %s5276_s9 }
 0x2b1   : > { %v1608_v51 = vpop.permute.xlu1 %1607  ;;  %v1602_v52 = vpop.permute.xlu0 %1601 }
 0x2b2   : > { %v1619_v55 = vcombine.low %v1185_v32, %v1608_v51  ;;  %v1620_v56 = vcombine.high %v1185_v32, %v1608_v51 }
 0x2b4   : > { %v1627_v62 = vrot.slane %v1619_v55, %v5999_v54  ;;  %v1634_v63 = vrot.slane %v1620_v56, %v5999_v54 }
 0x2b5   : > { %v1614_v57 = vpop.permute.xlu0 %1613  ;;  %v1610_v58 = vpop.permute.xlu1 %1609 }
 0x2b6   : > { %v1635_v59 = vcombine.low %v1602_v52, %v1614_v57  ;;  %v1636_v60 = vcombine.high %v1602_v52, %v1614_v57  ;;  %v1687_v13 = vcombine.low %v1188_v40, %v1610_v58  ;;  %v1688_v14 = vcombine.high %v1188_v40, %v1610_v58 }
 0x2b8   : > { %v1643_v0 = vrot.slane %v1635_v59, %v5999_v54  ;;  %v1650_v1 = vrot.slane %v1636_v60, %v5999_v54  ;;  %v1695_v23 = vrot.slane %v1687_v13, %v5999_v54  ;;  %v1702_v24 = vrot.slane %v1688_v14, %v5999_v54 }
 0x2b9   : > { %v1616_v2 = vpop.permute.xlu1 %1615  ;;  %v1306_v4 = vpop.permute.xlu0 %1305 }
 0x2ba   : > { %v1651_v5 = vcombine.low %v1627_v62, %v1643_v0  ;;  %v1652_v6 = vcombine.high %v1627_v62, %v1643_v0  ;;  %v1667_v7 = vcombine.low %v1634_v63, %v1650_v1  ;;  %v1668_v8 = vcombine.high %v1634_v63, %v1650_v1 }
 0x2bc   : > { %v1659_v9 = vrot.slane %v1651_v5, %v6002_v61  ;;  %v1666_v10 = vrot.slane %v1652_v6, %v6002_v61  ;;  %v1675_v11 = vrot.slane %v1667_v7, %v6002_v61  ;;  %v1682_v12 = vrot.slane %v1668_v8, %v6002_v61 }
 0x2bd   : > { %v1604_v15 = vpop.permute.xlu0 %1603  ;;  %v1308_v16 = vpop.permute.xlu1 %1307 }
 0x2be   : > { %v1703_v17 = vcombine.low %v1604_v15, %v1616_v2  ;;  %v1704_v18 = vcombine.high %v1604_v15, %v1616_v2  ;;  %v1755_v19 = vcombine.low %v1659_v9, %v1666_v10  ;;  %v4213_v20 = vcombine.high %v1659_v9, %v1666_v10 }
 0x2bf   : > { %v1771_v21 = vcombine.low %v1675_v11, %v1682_v12  ;;  %v4214_v22 = vcombine.high %v1675_v11, %v1682_v12 }
 0x2c0   : > { %v1711_v25 = vrot.slane %v1703_v17, %v5999_v54  ;;  %v1718_v26 = vrot.slane %v1704_v18, %v5999_v54  ;;  %v6021_v37 = vrot.slane %v1755_v19, %v5999_v54  ;;  %v6024_v38 = vrot.slane %v4213_v20, %v5999_v54 }
 0x2c1   : > { %v1312_v27 = vpop.permute.xlu0 %1311  ;;  %v1314_v28 = vpop.permute.xlu1 %1313  ;;  %v6027_v39 = vrot.slane %v1771_v21, %v5999_v54  ;;  %v6030_v40 = vrot.slane %v4214_v22, %v5999_v54 }
 0x2c2   : > { %v1323_v29 = vcombine.low %v5976_v42, %v1312_v27  ;;  %v1324_v30 = vcombine.high %v5976_v42, %v1312_v27  ;;  %v1391_v31 = vcombine.low %v5983_v43, %v1314_v28  ;;  %v1392_v32 = vcombine.high %v5983_v43, %v1314_v28 }
 0x2c3   : > { %v1719_v33 = vcombine.low %v1695_v23, %v1711_v25  ;;  %v1720_v34 = vcombine.high %v1695_v23, %v1711_v25  ;;  %v1735_v35 = vcombine.low %v1702_v24, %v1718_v26  ;;  %v1736_v36 = vcombine.high %v1702_v24, %v1718_v26 }
 0x2c4   : > { %v1331_v52 = vrot.slane %v1323_v29, %v5999_v54  ;;  %v1338_v53 = vrot.slane %v1324_v30, %v5999_v54  ;;  %v1399_v55 = vrot.slane %v1391_v31, %v5999_v54  ;;  %v1406_v56 = vrot.slane %v1392_v32, %v5999_v54 }
 0x2c5   : > { %v1727_v41 = vrot.slane %v1719_v33, %v6002_v61  ;;  %v1734_v42 = vrot.slane %v1720_v34, %v6002_v61  ;;  %v1743_v43 = vrot.slane %v1735_v35, %v6002_v61  ;;  %v1750_v44 = vrot.slane %v1736_v36, %v6002_v61  ;;  %v1318_v45 = vpop.permute.xlu0 %1317  ;;  %v1320_v46 = vpop.permute.xlu1 %1319 }
 0x2c6   : > { %v1339_v47 = vcombine.low %v1306_v4, %v1318_v45  ;;  %v1340_v48 = vcombine.high %v1306_v4, %v1318_v45  ;;  %v1407_v49 = vcombine.low %v1308_v16, %v1320_v46  ;;  %v1408_v51 = vcombine.high %v1308_v16, %v1320_v46 }
 0x2c7   : > { %v1823_v62 = vcombine.low %v1727_v41, %v1734_v42  ;;  %v4215_v63 = vcombine.high %v1727_v41, %v1734_v42  ;;  %v1839_v0 = vcombine.low %v1743_v43, %v1750_v44  ;;  %v4216_v1 = vcombine.high %v1743_v43, %v1750_v44 }
 0x2c8   : > { %v1347_v57 = vrot.slane %v1339_v47, %v5999_v54  ;;  %v1354_v58 = vrot.slane %v1340_v48, %v5999_v54  ;;  %v1415_v59 = vrot.slane %v1407_v49, %v5999_v54  ;;  %v1422_v60 = vrot.slane %v1408_v51, %v5999_v54 }
 0x2c9   : > { %v1830_v35 = vrot.slane %v1823_v62, %v5999_v54  ;;  %v1838_v36 = vrot.slane %v4215_v63, %v5999_v54  ;;  %v1846_v41 = vrot.slane %v1839_v0, %v5999_v54  ;;  %v1854_v42 = vrot.slane %v4216_v1, %v5999_v54 }
 0x2ca   : > { %v1355_v2 = vcombine.low %v1331_v52, %v1347_v57  ;;  %v1356_v4 = vcombine.high %v1331_v52, %v1347_v57  ;;  %v1371_v5 = vcombine.low %v1338_v53, %v1354_v58  ;;  %v1372_v6 = vcombine.high %v1338_v53, %v1354_v58 }
 0x2cb   : > { %v1423_v7 = vcombine.low %v1399_v55, %v1415_v59  ;;  %v1424_v8 = vcombine.high %v1399_v55, %v1415_v59  ;;  %v1439_v9 = vcombine.low %v1406_v56, %v1422_v60  ;;  %v1440_v10 = vcombine.high %v1406_v56, %v1422_v60 }
 0x2cc   : > { %v1363_v11 = vrot.slane %v1355_v2, %v6002_v61  ;;  %v1370_v12 = vrot.slane %v1356_v4, %v6002_v61  ;;  %v1379_v13 = vrot.slane %v1371_v5, %v6002_v61  ;;  %v1386_v14 = vrot.slane %v1372_v6, %v6002_v61 }
 0x2cd   : > { %v1431_v15 = vrot.slane %v1423_v7, %v6002_v61  ;;  %v1438_v16 = vrot.slane %v1424_v8, %v6002_v61  ;;  %v1447_v17 = vrot.slane %v1439_v9, %v6002_v61  ;;  %v1454_v18 = vrot.slane %v1440_v10, %v6002_v61 }
 0x2ce   : > { %v1459_v19 = vcombine.low %v1363_v11, %v1370_v12  ;;  %v4209_v20 = vcombine.high %v1363_v11, %v1370_v12  ;;  %v1475_v21 = vcombine.low %v1379_v13, %v1386_v14  ;;  %v4210_v22 = vcombine.high %v1379_v13, %v1386_v14 }
 0x2cf   : > { %v1527_v23 = vcombine.low %v1431_v15, %v1438_v16  ;;  %v4211_v24 = vcombine.high %v1431_v15, %v1438_v16  ;;  %v1543_v25 = vcombine.low %v1447_v17, %v1454_v18  ;;  %v4212_v26 = vcombine.high %v1447_v17, %v1454_v18 }
 0x2d0   : > { %v6053_v27 = vrot.slane %v1459_v19, %v5999_v54  ;;  %v6056_v28 = vrot.slane %v4209_v20, %v5999_v54  ;;  %v6059_v29 = vrot.slane %v1475_v21, %v5999_v54  ;;  %v1490_v30 = vrot.slane %v4210_v22, %v5999_v54 }
 0x2d1   : > { %v1534_v31 = vrot.slane %v1527_v23, %v5999_v54  ;;  %v1542_v32 = vrot.slane %v4211_v24, %v5999_v54  ;;  %v1550_v33 = vrot.slane %v1543_v25, %v5999_v54  ;;  %v1558_v34 = vrot.slane %v4212_v26, %v5999_v54 }
 0x2d2   : > { %v1491_v43 = vcombine.low %v6053_v27, %v6056_v28  ;;  %v1507_v44 = vcombine.low %v6059_v29, %v1490_v30  ;;  %v1787_v47 = vcombine.low %v6021_v37, %v6024_v38  ;;  %v1803_v48 = vcombine.low %v6027_v39, %v6030_v40 }
 0x2d3   : > { %v1559_v45 = vcombine.low %v1534_v31, %v1542_v32  ;;  %v1575_v46 = vcombine.low %v1550_v33, %v1558_v34  ;;  %v1855_v49 = vcombine.low %v1830_v35, %v1838_v36  ;;  %v1871_v51 = vcombine.low %v1846_v41, %v1854_v42 }
 0x2d4   : > { %v1795_v52 = vrot.slane %v1787_v47, %v6002_v61  ;;  %v1811_v53 = vrot.slane %v1803_v48, %v6002_v61  ;;  %v1499_v57 = vrot.slane %v1491_v43, %v6002_v61  ;;  %v1515_v58 = vrot.slane %v1507_v44, %v6002_v61  ;;  %v4200_v43 = vld [vmem:[%s932_s3] ss:$0 sm:$0xff]  ;;  %v1296_v44 = vpop.f32.mrb[4].mxu0  ;;  %s6670_s3 = sld [smem:[#allocation44_spill]] }
 0x2d5   : > { %v1863_v55 = vrot.slane %v1855_v49, %v6002_v61  ;;  %v1879_v56 = vrot.slane %v1871_v51, %v6002_v61  ;;  %v1567_v59 = vrot.slane %v1559_v45, %v6002_v61  ;;  %v1583_v60 = vrot.slane %v1575_v46, %v6002_v61  ;;  %v4478_v46 = vpop.f32.mrb[5].mxu0 }
 0x2d6   : > { %v1819_v62 = vcombine.low %v1795_v52, %v1811_v53  ;;  %v1523_v1 = vcombine.low %v1499_v57, %v1515_v58  ;;  %v1856_v6 = vcombine.high %v1830_v35, %v1838_v36  ;;  %v1872_v7 = vcombine.high %v1846_v41, %v1854_v42  ;;  %v1299_v47 = vpop.f32.mrb[6].mxu0 }
 0x2d7   : > { %v1887_v63 = vcombine.low %v1863_v55, %v1879_v56  ;;  %v1591_v2 = vcombine.low %v1567_v59, %v1583_v60  ;;  %v1888_v5 = vcombine.high %v1863_v55, %v1879_v56  ;;  %v1820_v8 = vcombine.high %v1795_v52, %v1811_v53  ;;  %v4479_v49 = vpop.f32.mrb[7].mxu0 }
 0x2d8   : > { %v1788_v9 = vcombine.high %v6021_v37, %v6024_v38  ;;  %v1804_v10 = vcombine.high %v6027_v39, %v6030_v40  ;;  %v1870_v13 = vrot.slane %v1856_v6, %v6002_v61  ;;  %v1886_v14 = vrot.slane %v1872_v7, %v6002_v61 }
 0x2d9   : > { %v1891_v0 = vpack.c.bf16 %v1887_v63, %v1819_v62  ;;  %v1595_v11 = vpack.c.bf16 %v1591_v2, %v1523_v1  ;;  %v1892_v12 = vpack.c.bf16 %v1888_v5, %v1820_v8  ;;  %v1492_v37 = vcombine.high %v6053_v27, %v6056_v28 }
 0x2da   : > { %v1802_v15 = vrot.slane %v1788_v9, %v6002_v61  ;;  %v1818_v16 = vrot.slane %v1804_v10, %v6002_v61  ;;  %v1889_v18 = vcombine.low %v1870_v13, %v1886_v14  ;;  %v1508_v38 = vcombine.high %v6059_v29, %v1490_v30 }
 0x2db   : > { %v2196_v4 = vsel %vm2191_vm1, %v1891_v0, 0  ;;  %v2243_v17 = vsel %vm2191_vm1, %v1892_v12, 0  ;;  %v1560_v39 = vcombine.high %v1534_v31, %v1542_v32  ;;  %v1576_v40 = vcombine.high %v1550_v33, %v1558_v34 }
 0x2dc   : > { %4481 = vmatpush3.bf16.xpose.msra.mxu1 %v2196_v4  ;;  %v1524_v19 = vcombine.high %v1499_v57, %v1515_v58  ;;  %v1592_v20 = vcombine.high %v1567_v59, %v1583_v60  ;;  %v1821_v21 = vcombine.low %v1802_v15, %v1818_v16  ;;  %v1506_v23 = vrot.slane %v1492_v37, %v6002_v61 }
 0x2dd   : > { %4486 = vmatprep.subr.bf16.mxu1 %v5272_v3  ;;  %v1522_v24 = vrot.slane %v1508_v38, %v6002_v61  ;;  %v1574_v25 = vrot.slane %v1560_v39, %v6002_v61  ;;  %v1590_v26 = vrot.slane %v1576_v40, %v6002_v61  ;;  %v1890_v29 = vcombine.high %v1870_v13, %v1886_v14 }
 0x2de   : > { %v1893_v22 = vpack.c.bf16 %v1889_v18, %v1821_v21  ;;  %v1596_v27 = vpack.c.bf16 %v1592_v20, %v1524_v19  ;;  %v1822_v32 = vcombine.high %v1802_v15, %v1818_v16  ;;  %v6125_v45 = vadd.f32 %v4200_v43, %v1296_v44 }
 0x2df   : > { %v1525_v30 = vcombine.low %v1506_v23, %v1522_v24  ;;  %v1593_v31 = vcombine.low %v1574_v25, %v1590_v26  ;;  %v1526_v36 = vcombine.high %v1506_v23, %v1522_v24  ;;  %v1594_v41 = vcombine.high %v1574_v25, %v1590_v26 }
 0x2e0   : > { %v2290_v28 = vsel %vm2191_vm1, %v1893_v22, 0  ;;  %v1894_v33 = vpack.c.bf16 %v1890_v29, %v1822_v32  ;;  %v6127_v48 = vadd.f32 %v4200_v43, %v1299_v47  ;;  %1897 = vrot.lane.b32.xlu1 %v6125_v45, %s5275_s2 }
 0x2e1   : > { %v1597_v34 = vpack.c.bf16 %v1593_v31, %v1525_v30  ;;  %v1598_v42 = vpack.c.bf16 %v1594_v41, %v1526_v36 }
 0x2e2   : > { %v2337_v35 = vsel %vm2191_vm1, %v1894_v33, 0 }
 0x2e3   : > { %4483 = vmatmul.mubr.msk.bf16.vlgmr.msra.gmra.mrb[4].mxu1 %vm2191_vm1, %v1595_v11 }
 0x2e4   : > { %4487 = vmatpush3.bf16.xpose.msra.mxu1 %v2243_v17  ;;  %4488 = vmatprep.mubr.msk.bf16.mxu1 %vm5273_vm0, %v5272_v3 }
 0x2e5   : > { %4492 = vmatprep.subr.bf16.mxu1 %v5272_v3 }
 0x2eb   : > { %4489 = vmatmul.mubr.msk.bf16.vlgmr.msra.gmra.mrb[8].mxu1 %vm2191_vm1, %v1596_v27 }
 0x2ec   : > { %4493 = vmatpush3.bf16.xpose.msra.mxu1 %v2290_v28  ;;  %4494 = vmatprep.mubr.msk.bf16.mxu1 %vm5273_vm0, %v5272_v3 }
 0x2ed   : > { %4498 = vmatprep.subr.bf16.mxu1 %v5272_v3 }
 0x2f3   : > { %4495 = vmatmul.mubr.msk.bf16.vlgmr.msra.gmra.mrb[12].mxu1 %vm2191_vm1, %v1597_v34 }
 0x2f4   : > { %4499 = vmatpush3.bf16.xpose.msra.mxu1 %v2337_v35  ;;  %4500 = vmatprep.mubr.msk.bf16.mxu1 %vm5273_vm0, %v5272_v3 }
 0x2f5   : > { %4504 = vmatprep.subr.bf16.mxu1 %v5272_v3 }
 0x2fb   : > { %4501 = vmatmul.mubr.msk.bf16.vlgmr.msra.gmra.mrb[16].mxu1 %vm2191_vm1, %v1598_v42 }
 0x2fc   : > { %4506 = vmatprep.mubr.msk.bf16.mxu1 %vm5273_vm0, %v5272_v3 }
 0x352   : > { %v6145_v40 = vpop.permute.xlu1 %1897 }
 0x3b6   : > { %v2232_v51 = vpop.f32.mrb[4].mxu1 }
 0x3b7   : > { %v2380_v52 = vmul.f32 0.17677669, %v2232_v51  ;;  %v4484_v53 = vpop.f32.mrb[5].mxu1 }
 0x3b8   : > { %v2235_v55 = vpop.f32.mrb[6].mxu1 }
 0x3b9   : > { %v2381_v56 = vmul.f32 0.17677669, %v2235_v55  ;;  %v4485_v57 = vpop.f32.mrb[7].mxu1  ;;  %v2389_v58 = vsel %vm2388_vm2, %v2380_v52, -inf }
 0x3ba   : > { %2390 = vmax.xlane.f32.xlu0 %v2389_v58 }
 0x3bb   : > { %v2392_v59 = vsel %vm2388_vm2, %v2381_v56, -inf }
 0x3bc   : > { %2393 = vmax.xlane.f32.xlu1 %v2392_v59 }
 0x3be   : > { %v2279_v60 = vpop.f32.mrb[8].mxu1 }
 0x3bf   : > { %v2382_v62 = vmul.f32 0.17677669, %v2279_v60  ;;  %v4490_v63 = vpop.f32.mrb[9].mxu1 }
 0x3c0   : > { %v2282_v0 = vpop.f32.mrb[10].mxu1 }
 0x3c1   : > { %v2383_v1 = vmul.f32 0.17677669, %v2282_v0  ;;  %v4491_v2 = vpop.f32.mrb[11].mxu1  ;;  %v2395_v4 = vsel %vm2388_vm2, %v2382_v62, -inf }
 0x3c2   : > { %2396 = vmax.xlane.f32.xlu0 %v2395_v4 }
 0x3c3   : > { %v2398_v5 = vsel %vm2388_vm2, %v2383_v1, -inf }
 0x3c6   : > { %2399 = vmax.xlane.f32.xlu0 %v2398_v5  ;;  %v2326_v6 = vpop.f32.mrb[12].mxu1 }
 0x3c7   : > { %v2384_v7 = vmul.f32 0.17677669, %v2326_v6  ;;  %v4496_v8 = vpop.f32.mrb[13].mxu1 }
 0x3c8   : > { %v2329_v9 = vpop.f32.mrb[14].mxu1 }
 0x3c9   : > { %v2385_v10 = vmul.f32 0.17677669, %v2329_v9  ;;  %v4497_v11 = vpop.f32.mrb[15].mxu1  ;;  %v2401_v12 = vsel %vm2388_vm2, %v2384_v7, -inf }
 0x3ca   : > { %2402 = vmax.xlane.f32.xlu1 %v2401_v12 }
 0x3cb   : > { %v2404_v13 = vsel %vm2388_vm2, %v2385_v10, -inf }
 0x3cc   : > { %2405 = vmax.xlane.f32.xlu0 %v2404_v13 }
 0x3ce   : > { %v2373_v14 = vpop.f32.mrb[16].mxu1 }
 0x3cf   : > { %v2386_v15 = vmul.f32 0.17677669, %v2373_v14  ;;  %v4502_v16 = vpop.f32.mrb[17].mxu1 }
 0x3d0   : > { %v2376_v17 = vpop.f32.mrb[18].mxu1 }
 0x3d1   : > { %v2387_v18 = vmul.f32 0.17677669, %v2376_v17  ;;  %v4503_v37 = vpop.f32.mrb[19].mxu1  ;;  %v2407_v38 = vsel %vm2388_vm2, %v2386_v15, -inf }
 0x3d2   : > { %2408 = vmax.xlane.f32.xlu1 %v2407_v38 }
 0x3d3   : > { %v2410_v39 = vsel %vm2388_vm2, %v2387_v18, -inf }
 0x3d4   : > { %2411 = vmax.xlane.f32.xlu0 %v2410_v39 }
 0x3e3   : > { %1903 = vrot.lane.b32.xlu1 %v6125_v45, %s5274_s8 }
 0x3e7   : > { %1905 = vrot.lane.b32.xlu1 %v6127_v48, %s5274_s8 }
 0x3ea   : > { %1899 = vrot.lane.b32.xlu0 %v6127_v48, %s5275_s2 }
 0x447   : > { %v2391_v19 = vpop.xlane.xlu0 %2390 }
 0x448   : > { %v2413_v20 = vsub.f32 %v2380_v52, %v2391_v19 }
 0x449   : > { %v2394_v21 = vpop.xlane.xlu1 %2393 }
 0x44a   : > { %v2421_v22 = vmul.f32 1.442695, %v2413_v20  ;;  %v2414_v23 = vsub.f32 %v2381_v56, %v2394_v21 }
 0x44c   : > { %4847 = vpow2.f32 %v2421_v22  ;;  %v2423_v24 = vmul.f32 1.442695, %v2414_v23 }
 0x44e   : > { %4849 = vpow2.f32 %v2423_v24 }
 0x44f   : > { %v2397_v29 = vpop.xlane.xlu0 %2396 }
 0x450   : > { %v2415_v34 = vsub.f32 %v2382_v62, %v2397_v29 }
 0x452   : > { %v2425_v41 = vmul.f32 1.442695, %v2415_v34 }
 0x453   : > { %v2400_v30 = vpop.xlane.xlu0 %2399 }
 0x454   : > { %v2416_v32 = vsub.f32 %v2383_v1, %v2400_v30 }
 0x456   : > { %v6147_v25 = vpop.eup %4847  ;;  %v2427_v35 = vmul.f32 1.442695, %v2416_v32 }
 0x457   : > { %v2437_v26 = vsel %vm2388_vm2, %v6147_v25, 0.0  ;;  %v2403_v31 = vpop.xlane.xlu1 %2402 }
 0x458   : > { %v6151_v27 = vpop.eup %4849  ;;  %2438 = vadd.xlane.f32.xlu1 %v2437_v26  ;;  %v2417_v42 = vsub.f32 %v2384_v7, %v2403_v31  ;;  %4851 = vpow2.f32 %v2427_v35 }
 0x459   : > { %v2440_v28 = vsel %vm2388_vm2, %v6151_v27, 0.0  ;;  %v2406_v43 = vpop.xlane.xlu0 %2405  ;;  %4853 = vpow2.f32 %v2425_v41 }
 0x45a   : > { %2441 = vadd.xlane.f32.xlu0 %v2440_v28  ;;  %v2429_v46 = vmul.f32 1.442695, %v2417_v42  ;;  %v2418_v47 = vsub.f32 %v2385_v10, %v2406_v43 }
 0x45c   : > { %v2431_v51 = vmul.f32 1.442695, %v2418_v47 }
 0x45f   : > { %v2409_v33 = vpop.xlane.xlu1 %2408 }
 0x460   : > { %v2419_v36 = vsub.f32 %v2386_v15, %v2409_v33 }
 0x461   : > { %v2412_v49 = vpop.xlane.xlu0 %2411 }
 0x462   : > { %v2433_v44 = vmul.f32 1.442695, %v2419_v36  ;;  %v2420_v52 = vsub.f32 %v2387_v18, %v2412_v49  ;;  %v6159_v53 = vpop.eup %4851 }
 0x463   : > { %v6161_v56 = vpop.eup %4853  ;;  %v2446_v57 = vsel %vm2388_vm2, %v6159_v53, 0.0  ;;  %v1904_v5 = vpop.permute.xlu1 %1903 }
 0x464   : > { %4855 = vpow2.f32 %v2433_v44  ;;  %v2435_v55 = vmul.f32 1.442695, %v2420_v52  ;;  %v2443_v59 = vsel %vm2388_vm2, %v6161_v56, 0.0  ;;  %v1915_v15 = vcombine.low %v6125_v45, %v1904_v5 }
 0x465   : > { %4857 = vpow2.f32 %v2429_v46  ;;  %v1900_v7 = vpop.permute.xlu0 %1899  ;;  %v1916_v16 = vcombine.high %v6125_v45, %v1904_v5 }
 0x466   : > { %4859 = vpow2.f32 %v2431_v51  ;;  %v1923_v24 = vrot.slane %v1915_v15, %v5999_v54 }
 0x467   : > { %4861 = vpow2.f32 %v2435_v55  ;;  %v1906_v6 = vpop.permute.xlu1 %1905 }
 0x468   : > { %v1983_v9 = vcombine.low %v6127_v48, %v1906_v6  ;;  %v1984_v10 = vcombine.high %v6127_v48, %v1906_v6 }
 0x469   : > { %1911 = vrot.lane.b32.xlu1 %v6127_v48, %s5276_s9 }
 0x46a   : > { %v1991_v17 = vrot.slane %v1983_v9, %v5999_v54  ;;  %v1998_v18 = vrot.slane %v1984_v10, %v5999_v54 }
 0x46e   : > { %v6165_v58 = vpop.eup %4855 }
 0x46f   : > { %v6169_v60 = vpop.eup %4857  ;;  %v2455_v62 = vsel %vm2388_vm2, %v6165_v58, 0.0 }
 0x470   : > { %1909 = vrot.lane.b32.xlu0 %v6125_v45, %s5276_s9  ;;  %v2449_v63 = vsel %vm2388_vm2, %v6169_v60, 0.0  ;;  %v6175_v0 = vpop.eup %4859  ;;  %v1930_v45 = vrot.slane %v1916_v16, %v5999_v54 }
 0x471   : > { %v2452_v1 = vsel %vm2388_vm2, %v6175_v0, 0.0  ;;  %v6179_v2 = vpop.eup %4861 }
 0x472   : > { %v2458_v4 = vsel %vm2388_vm2, %v6179_v2, 0.0 }
 0x48d   : > { %2447 = vadd.xlane.f32.xlu1 %v2446_v57 }
 0x48f   : > { %2444 = vadd.xlane.f32.xlu0 %v2443_v59 }
 0x491   : > { %2456 = vadd.xlane.f32.xlu1 %v2455_v62 }
 0x493   : > { %2450 = vadd.xlane.f32.xlu0 %v2449_v63 }
 0x497   : > { %2453 = vadd.xlane.f32.xlu0 %v2452_v1 }
 0x49b   : > { %2459 = vadd.xlane.f32.xlu0 %v2458_v4 }
 0x4e5   : > { %v2439_v8 = vpop.xlane.xlu1 %2438 }
 0x4e6   : > { %4863 = vrcp.f32 %v2439_v8 }
 0x4e7   : > { %v2442_v11 = vpop.xlane.xlu0 %2441 }
 0x4e8   : > { %4865 = vrcp.f32 %v2442_v11 }
 0x4e9   : > { %v1912_v12 = vpop.permute.xlu1 %1911 }
 0x4ea   : > { %v1999_v13 = vcombine.low %v1900_v7, %v1912_v12  ;;  %v2000_v14 = vcombine.high %v1900_v7, %v1912_v12 }
 0x4eb   : > { %v1910_v37 = vpop.permute.xlu0 %1909 }
 0x4ec   : > { %v2007_v38 = vrot.slane %v1999_v13, %v5999_v54  ;;  %v2014_v39 = vrot.slane %v2000_v14, %v5999_v54  ;;  %v1931_v19 = vcombine.low %v6145_v40, %v1910_v37  ;;  %v1932_v48 = vcombine.high %v6145_v40, %v1910_v37 }
 0x4ee   : > { %v2015_v20 = vcombine.low %v1991_v17, %v2007_v38  ;;  %v2016_v21 = vcombine.high %v1991_v17, %v2007_v38  ;;  %v2031_v22 = vcombine.low %v1998_v18, %v2014_v39  ;;  %v2032_v23 = vcombine.high %v1998_v18, %v2014_v39 }
 0x4ef   : > { %v1939_v26 = vrot.slane %v1931_v19, %v5999_v54  ;;  %v1946_v28 = vrot.slane %v1932_v48, %v5999_v54 }
 0x4f0   : > { %v2023_v29 = vrot.slane %v2015_v20, %v6002_v61  ;;  %v2030_v30 = vrot.slane %v2016_v21, %v6002_v61  ;;  %v2039_v31 = vrot.slane %v2031_v22, %v6002_v61  ;;  %v2046_v40 = vrot.slane %v2032_v23, %v6002_v61  ;;  %v4864_v11 = vpop.eup %4863 }
 0x4f1   : > { %v1947_v32 = vcombine.low %v1923_v24, %v1939_v26  ;;  %v1948_v33 = vcombine.high %v1923_v24, %v1939_v26  ;;  %v1963_v34 = vcombine.low %v1930_v45, %v1946_v28  ;;  %v1964_v46 = vcombine.high %v1930_v45, %v1946_v28 }
 0x4f2   : > { %v2119_v35 = vcombine.low %v2023_v29, %v2030_v30  ;;  %v4219_v36 = vcombine.high %v2023_v29, %v2030_v30  ;;  %v2135_v41 = vcombine.low %v2039_v31, %v2046_v40  ;;  %v4220_v42 = vcombine.high %v2039_v31, %v2046_v40  ;;  %v4866_v16 = vpop.eup %4865 }
 0x4f3   : > { %v1955_v43 = vrot.slane %v1947_v32, %v6002_v61  ;;  %v1962_v44 = vrot.slane %v1948_v33, %v6002_v61  ;;  %v1971_v55 = vrot.slane %v1963_v34, %v6002_v61  ;;  %v1978_v57 = vrot.slane %v1964_v46, %v6002_v61 }
 0x4f4   : > { %v2126_v47 = vrot.slane %v2119_v35, %v5999_v54  ;;  %v2134_v49 = vrot.slane %v4219_v36, %v5999_v54  ;;  %v2142_v51 = vrot.slane %v2135_v41, %v5999_v54  ;;  %v2150_v52 = vrot.slane %v4220_v42, %v5999_v54 }
 0x4f5   : > { %v2051_v59 = vcombine.low %v1955_v43, %v1962_v44  ;;  %v4217_v62 = vcombine.high %v1955_v43, %v1962_v44  ;;  %v2067_v6 = vcombine.low %v1971_v55, %v1978_v57  ;;  %v4218_v7 = vcombine.high %v1971_v55, %v1978_v57 }
 0x4f6   : > { %v2151_v63 = vcombine.low %v2126_v47, %v2134_v49  ;;  %v2167_v1 = vcombine.low %v2142_v51, %v2150_v52  ;;  %v2470_v38 = vmul.f32 %v4866_v16, %v6151_v27  ;;  %v2469_v48 = vmul.f32 %v4864_v11, %v6147_v25 }
 0x4f7   : > { %v2058_v4 = vrot.slane %v2051_v59, %v5999_v54  ;;  %v2066_v5 = vrot.slane %v4217_v62, %v5999_v54  ;;  %v2074_v8 = vrot.slane %v2067_v6, %v5999_v54  ;;  %v2082_v9 = vrot.slane %v4218_v7, %v5999_v54  ;;  %v4761_v6 = vld [vmem:[%s5838_s0 + $0x10] sm:$0xff]   ;;  %v4762_v7 = vld [vmem:[%s5838_s0 + $0x18] sm:$0xff]  }
 0x4f8   : > { %v2159_v14 = vrot.slane %v2151_v63, %v6002_v61  ;;  %v2175_v15 = vrot.slane %v2167_v1, %v6002_v61  ;;  %v2477_v21 = vpack.c.bf16 %v2470_v38, %v2469_v48  ;;  %v2152_v26 = vcombine.high %v2126_v47, %v2134_v49 }
 0x4f9   : > { %v2083_v10 = vcombine.low %v2058_v4, %v2066_v5  ;;  %v2099_v13 = vcombine.low %v2074_v8, %v2082_v9  ;;  %v2084_v24 = vcombine.high %v2058_v4, %v2066_v5  ;;  %v2100_v25 = vcombine.high %v2074_v8, %v2082_v9  ;;  %v4760_v5 = vld [vmem:[%s5838_s0 + $0x8] sm:$0xff]  }
 0x4fa   : > { %v2183_v37 = vcombine.low %v2159_v14, %v2175_v15  ;;  %v2184_v20 = vcombine.high %v2159_v14, %v2175_v15  ;;  %v2168_v28 = vcombine.high %v2142_v51, %v2150_v52  ;;  %v2166_v32 = vrot.slane %v2152_v26, %v6002_v61 }
 0x4fb   : > { %v2091_v12 = vrot.slane %v2083_v10, %v6002_v61  ;;  %v2107_v17 = vrot.slane %v2099_v13, %v6002_v61  ;;  %v2098_v29 = vrot.slane %v2084_v24, %v6002_v61  ;;  %v2114_v30 = vrot.slane %v2100_v25, %v6002_v61 }
 0x4fc   : > { %v2182_v33 = vrot.slane %v2168_v28, %v6002_v61 }
 0x4fd   : > { %v2115_v18 = vcombine.low %v2091_v12, %v2107_v17  ;;  %v2116_v19 = vcombine.high %v2091_v12, %v2107_v17  ;;  %v2117_v35 = vcombine.low %v2098_v29, %v2114_v30 }
 0x4fe   : > { %v2185_v44 = vcombine.low %v2166_v32, %v2182_v33  ;;  %v2186_v55 = vcombine.high %v2166_v32, %v2182_v33 }
 0x4ff   : > { %v2187_v39 = vpack.c.bf16 %v2183_v37, %v2115_v18  ;;  %v2188_v22 = vpack.c.bf16 %v2184_v20, %v2116_v19 }
 0x500   : > { %v2189_v47 = vpack.c.bf16 %v2185_v44, %v2117_v35 }
 0x501   : > { %4505 = vmatpush3.bf16.msra.mxu1 %v2187_v39 }
 0x502   : > { %4510 = vmatprep.subr.bf16.mxu1 %v5272_v3 }
 0x504   : > { %4507 = vmatmul.mubr.msk.bf16.vlgmr.msra.gmra.mrb[20].mxu1 %vm2388_vm2, %v2477_v21 }
 0x505   : > { %4511 = vmatpush3.bf16.msra.mxu1 %v2188_v22  ;;  %4512 = vmatprep.mubr.msk.bf16.mxu1 %vm5273_vm0, %v5272_v3 }
 0x506   : > { %4516 = vmatprep.subr.bf16.mxu1 %v5272_v3 }
 0x51a   : > { %v2448_v23 = vpop.xlane.xlu1 %2447 }
 0x51b   : > { %4867 = vrcp.f32 %v2448_v23 }
 0x51c   : > { %v2445_v27 = vpop.xlane.xlu0 %2444 }
 0x51d   : > { %4869 = vrcp.f32 %v2445_v27 }
 0x51e   : > { %v2457_v42 = vpop.xlane.xlu1 %2456 }
 0x520   : > { %v2451_v45 = vpop.xlane.xlu0 %2450 }
 0x521   : > { %4871 = vrcp.f32 %v2451_v45 }
 0x524   : > { %v2454_v31 = vpop.xlane.xlu0 %2453 }
 0x525   : > { %v4868_v40 = vpop.eup %4867  ;;  %4873 = vrcp.f32 %v2454_v31 }
 0x526   : > { %v2472_v36 = vmul.f32 %v4868_v40, %v6159_v53  ;;  %v2118_v53 = vcombine.high %v2098_v29, %v2114_v30 }
 0x527   : > { %v4870_v34 = vpop.eup %4869 }
 0x528   : > { %v2471_v41 = vmul.f32 %v4870_v34, %v6161_v56  ;;  %v2460_v43 = vpop.xlane.xlu0 %2459  ;;  %v2190_v62 = vpack.c.bf16 %v2186_v55, %v2118_v53 }
 0x529   : > { %4875 = vrcp.f32 %v2460_v43 }
 0x52a   : > { %v2478_v46 = vpack.c.bf16 %v2472_v36, %v2471_v41  ;;  %4877 = vrcp.f32 %v2457_v42 }
 0x52b   : > { %v4872_v49 = vpop.eup %4871 }
 0x52c   : > { %4513 = vmatmul.mubr.msk.bf16.vlgmr.msra.gmra.mrb[24].mxu1 %vm2388_vm2, %v2478_v46  ;;  %v2473_v56 = vmul.f32 %v4872_v49, %v6169_v60 }
 0x52d   : > { %4517 = vmatpush3.bf16.msra.mxu1 %v2189_v47  ;;  %4518 = vmatprep.mubr.msk.bf16.mxu1 %vm5273_vm0, %v5272_v3 }
 0x52e   : > { %4522 = vmatprep.subr.bf16.mxu1 %v5272_v3 }
 0x52f   : > { %v4874_v51 = vpop.eup %4873 }
 0x530   : > { %v2474_v52 = vmul.f32 %v4874_v51, %v6175_v0  ;;  %v4759_v0 = vld [vmem:[%s5838_s0] sm:$0xff]  }
 0x531   : > { %4529 = vmatpush3.bf16.msra.mxu0 %v4759_v0 }
 0x532   : > { %v2479_v57 = vpack.c.bf16 %v2474_v52, %v2473_v56  ;;  %4530 = vmatprep.subr.bf16.mxu0 %v5272_v3 }
 0x533   : > { %v4876_v59 = vpop.eup %4875 }
 0x534   : > { %4519 = vmatmul.mubr.msk.bf16.vlgmr.msra.gmra.mrb[28].mxu1 %vm2388_vm2, %v2479_v57  ;;  %v4878_v63 = vpop.eup %4877  ;;  %v2476_v1 = vmul.f32 %v4876_v59, %v6179_v2  ;;  %v4763_v2 = vld [vmem:[%s5838_s0 + $0x20] sm:$0xff]  }
 0x535   : > { %4523 = vmatpush3.bf16.msra.mxu1 %v2190_v62  ;;  %4524 = vmatprep.mubr.msk.bf16.mxu1 %vm5273_vm0, %v5272_v3  ;;  %v2475_v60 = vmul.f32 %v4878_v63, %v6165_v58  ;;  %v4764_v58 = vld [vmem:[%s5838_s0 + $0x28] sm:$0xff]  }
 0x536   : > { %4531 = vmatpush3.bf16.msra.mxu0 %v4760_v5 }
 0x537   : > { %v2480_v4 = vpack.c.bf16 %v2476_v1, %v2475_v60  ;;  %4532 = vmatprep.subr.bf16.mxu0 %v5272_v3 }
 0x53a   : > { %4533 = vmatpush3.bf16.msra.mxu0 %v4761_v6 }
 0x53b   : > { %4534 = vmatprep.subr.bf16.mxu0 %v5272_v3 }
 0x53c   : > { %4525 = vmatmul.mubr.msk.bf16.vlgmr.msra.gmra.mrb[32].mxu1 %vm2388_vm2, %v2480_v4 }
 0x53e   : > { %4535 = vmatpush3.bf16.msra.mxu0 %v4762_v7 }
 0x53f   : > { %4536 = vmatprep.subr.bf16.mxu0 %v5272_v3 }
 0x542   : > { %4537 = vmatpush3.bf16.msra.mxu0 %v4763_v2 }
 0x543   : > { %4538 = vmatprep.subr.bf16.mxu0 %v5272_v3 }
 0x546   : > { %4539 = vmatpush3.bf16.msra.mxu0 %v4764_v58 }
 0x547   : > { %4540 = vmatprep.subr.bf16.mxu0 %v5272_v3 }
 0x5d7   : > { %v2518_v8 = vpop.f32.mrb[20].mxu1 }
 0x5d8   : > { %v4508_v9 = vpop.f32.mrb[21].mxu1 }
 0x5d9   : > { %v2521_v10 = vpop.f32.mrb[22].mxu1 }
 0x5da   : > { %v4509_v11 = vpop.f32.mrb[23].mxu1 }
 0x5ff   : > { %v2562_v12 = vpop.f32.mrb[24].mxu1 }
 0x600   : > { %v4514_v13 = vpop.f32.mrb[25].mxu1 }
 0x601   : > { %v2565_v14 = vpop.f32.mrb[26].mxu1 }
 0x602   : > { %v4515_v15 = vpop.f32.mrb[27].mxu1 }
 0x607   : > { %v2606_v16 = vpop.f32.mrb[28].mxu1 }
 0x608   : > { %v2657_v17 = vcombine.low %v2518_v8, %v2606_v16  ;;  %v2658_v18 = vcombine.high %v2518_v8, %v2606_v16  ;;  %v4520_v37 = vpop.f32.mrb[29].mxu1 }
 0x609   : > { %v2609_v38 = vpop.f32.mrb[30].mxu1 }
 0x60a   : > { %v2725_v39 = vcombine.low %v2521_v10, %v2609_v38  ;;  %v2726_v19 = vcombine.high %v2521_v10, %v2609_v38  ;;  %v4521_v48 = vpop.f32.mrb[31].mxu1  ;;  %v2665_v27 = vrot.slane %v2657_v17, %v5999_v54  ;;  %v2672_v24 = vrot.slane %v2658_v18, %v5999_v54 }
 0x60c   : > { %v2733_v34 = vrot.slane %v2725_v39, %v5999_v54  ;;  %v2740_v35 = vrot.slane %v2726_v19, %v5999_v54 }
 0x60f   : > { %v2650_v20 = vpop.f32.mrb[32].mxu1 }
 0x610   : > { %v2673_v21 = vcombine.low %v2562_v12, %v2650_v20  ;;  %v2674_v22 = vcombine.high %v2562_v12, %v2650_v20  ;;  %v4526_v23 = vpop.f32.mrb[33].mxu1  ;;  %v4765_v12 = vld [vmem:[%s5838_s0 + $0x30] sm:$0xff]  }
 0x611   : > { %v2653_v25 = vpop.f32.mrb[34].mxu1  ;;  %4541 = vmatpush3.bf16.msra.mxu0 %v4765_v12  ;;  %v4776_v12 = vld [vmem:[%s6670_s3 + $0x28] ss:$16 sps:$4 sm:$0xff]  }
 0x612   : > { %v2681_v45 = vrot.slane %v2673_v21, %v5999_v54  ;;  %v2688_v26 = vrot.slane %v2674_v22, %v5999_v54  ;;  %v2741_v28 = vcombine.low %v2565_v14, %v2653_v25  ;;  %v2742_v29 = vcombine.high %v2565_v14, %v2653_v25  ;;  %v4527_v30 = vpop.f32.mrb[35].mxu1  ;;  %4542 = vmatprep.subr.bf16.mxu0 %v5272_v3 }
 0x614   : > { %v2689_v31 = vcombine.low %v2665_v27, %v2681_v45  ;;  %v2690_v40 = vcombine.high %v2665_v27, %v2681_v45  ;;  %v2705_v32 = vcombine.low %v2672_v24, %v2688_v26  ;;  %v2706_v33 = vcombine.high %v2672_v24, %v2688_v26  ;;  %v4766_v26 = vld [vmem:[%s5838_s0 + $0x38] sm:$0xff]   ;;  %s3837_s0 = sshll.u32 %s5897_s25, 4  ;;  %s6414_s0 = int_to_ptr.vmem [resolvable:$true] %s3837_s0 }
 0x615   : > { %v2749_v36 = vrot.slane %v2741_v28, %v5999_v54  ;;  %v2756_v41 = vrot.slane %v2742_v29, %v5999_v54  ;;  %4543 = vmatpush3.bf16.msra.mxu0 %v4766_v26  ;;  %v4799_v26 = vld [vmem:[%s6670_s3 + $0xa4] ss:$16 sps:$4 sm:$0xff]   ;;  %s5099_s27 = scalar_lea.vmem %s6414_s0, 256 }
 0x616   : > { %v2697_v42 = vrot.slane %v2689_v31, %v6002_v61  ;;  %v2704_v43 = vrot.slane %v2690_v40, %v6002_v61  ;;  %v2713_v44 = vrot.slane %v2705_v32, %v6002_v61  ;;  %v2720_v46 = vrot.slane %v2706_v33, %v6002_v61  ;;  %p5100_p10 = scmp.ne.s32.totalorder %s6414_s0, %s5099_s27 }
 0x617   : > { %v2757_v47 = vcombine.low %v2733_v34, %v2749_v36  ;;  %v2758_v49 = vcombine.high %v2733_v34, %v2749_v36  ;;  %v2773_v51 = vcombine.low %v2740_v35, %v2756_v41  ;;  %v2774_v53 = vcombine.high %v2740_v35, %v2756_v41 }
 0x618   : > { %v2793_v56 = vcombine.low %v2697_v42, %v2704_v43  ;;  %v4229_v52 = vcombine.high %v2697_v42, %v2704_v43  ;;  %v2809_v55 = vcombine.low %v2713_v44, %v2720_v46  ;;  %v4230_v57 = vcombine.high %v2713_v44, %v2720_v46 }
 0x619   : > { %v2765_v59 = vrot.slane %v2757_v47, %v6002_v61  ;;  %v2772_v62 = vrot.slane %v2758_v49, %v6002_v61  ;;  %v2781_v63 = vrot.slane %v2773_v51, %v6002_v61  ;;  %v2788_v1 = vrot.slane %v2774_v53, %v6002_v61 }
 0x61a   : > { %v2800_v60 = vrot.slane %v2793_v56, %v5999_v54  ;;  %v2808_v4 = vrot.slane %v4229_v52, %v5999_v54  ;;  %v2816_v0 = vrot.slane %v2809_v55, %v5999_v54  ;;  %v2824_v5 = vrot.slane %v4230_v57, %v5999_v54  ;;  %v4233_v55 = vld [vmem:[%s6672_s26] ss:$0 sm:$0xff]  ;;  %s6683_s26 = sld [smem:[#allocation62_spill]] }
 0x61b   : > { %v2861_v6 = vcombine.low %v2765_v59, %v2772_v62  ;;  %v4231_v7 = vcombine.high %v2765_v59, %v2772_v62  ;;  %v2877_v2 = vcombine.low %v2781_v63, %v2788_v1  ;;  %v4232_v58 = vcombine.high %v2781_v63, %v2788_v1 }
 0x61c   : > { %v2826_v8 = vcombine.high %v2800_v60, %v2808_v4  ;;  %v2842_v9 = vcombine.high %v2816_v0, %v2824_v5  ;;  %v2825_v10 = vcombine.low %v2800_v60, %v2808_v4  ;;  %v2841_v11 = vcombine.low %v2816_v0, %v2824_v5  ;;  %v4887_v4 = vld [vmem:[#allocation2] sm:$0xff]  ;;  %v4888_v5 = vld [vmem:[#allocation2 + $0x8] sm:$0xff] }
 0x61d   : > { %v2868_v13 = vrot.slane %v2861_v6, %v5999_v54  ;;  %v2876_v14 = vrot.slane %v4231_v7, %v5999_v54  ;;  %v2884_v15 = vrot.slane %v2877_v2, %v5999_v54  ;;  %v2892_v16 = vrot.slane %v4232_v58, %v5999_v54  ;;  %v4767_v7 = vld [vmem:[%s6670_s3] ss:$16 sps:$4 sm:$0xff]   ;;  %v4769_v2 = vld [vmem:[%s6670_s3 + $0x4] ss:$16 sps:$4 sm:$0xff]   ;;  %v4770_v58 = vld [vmem:[%s6670_s3 + $0x8] ss:$16 sps:$4 sm:$0xff]  }
 0x61e   : > { %v2840_v17 = vrot.slane %v2826_v8, %v6002_v61  ;;  %v2856_v18 = vrot.slane %v2842_v9, %v6002_v61  ;;  %v2833_v37 = vrot.slane %v2825_v10, %v6002_v61  ;;  %v2849_v38 = vrot.slane %v2841_v11, %v6002_v61  ;;  %v4772_v8 = vld [vmem:[%s6670_s3 + $0xc] ss:$16 sps:$4 sm:$0xff]   ;;  %v4775_v9 = vld [vmem:[%s6670_s3 + $0x24] ss:$16 sps:$4 sm:$0xff]   ;;  %3332 = vmatprep.subr.bf16.mxu1 %v4769_v2  ;;  %v4773_v11 = vld [vmem:[%s6670_s3 + $0x20] ss:$16 sps:$4 sm:$0xff]  }
 0x61f   : > { %v2894_v39 = vcombine.high %v2868_v13, %v2876_v14  ;;  %v2910_v19 = vcombine.high %v2884_v15, %v2892_v16  ;;  %v2893_v48 = vcombine.low %v2868_v13, %v2876_v14  ;;  %v2909_v20 = vcombine.low %v2884_v15, %v2892_v16  ;;  %v4778_v10 = vld [vmem:[%s6670_s3 + $0x2c] ss:$16 sps:$4 sm:$0xff]   ;;  %3375 = vmatprep.subr.bf16.mxu0 %v4772_v8  ;;  %v4823_v8 = vld [vmem:[%s5895_s22 + $0x50] sm:$0xff]  }
 0x620   : > { %v2859_v21 = vcombine.low %v2840_v17, %v2856_v18  ;;  %v2857_v22 = vcombine.low %v2833_v37, %v2849_v38  ;;  %v2858_v23 = vcombine.high %v2833_v37, %v2849_v38  ;;  %v2860_v54 = vcombine.high %v2840_v17, %v2856_v18  ;;  %3333 = vmatpush1.bf16.msra.mxu1 %v4767_v7  ;;  %v4820_v7 = vld [vmem:[%s5895_s22 + $0xc8] sm:$0xff]   ;;  %s6684_s14 = smov %s6683_s26 }
 0x621   : > { %v2908_v27 = vrot.slane %v2894_v39, %v6002_v61  ;;  %v2924_v24 = vrot.slane %v2910_v19, %v6002_v61  ;;  %v2901_v25 = vrot.slane %v2893_v48, %v6002_v61  ;;  %v2917_v45 = vrot.slane %v2909_v20, %v6002_v61  ;;  %3334 = vmatprep.subr.bf16.mxu1 %v4775_v9  ;;  %v4781_v39 = vld [vmem:[%s6670_s3 + $0x44] ss:$16 sps:$4 sm:$0xff]   ;;  %v4784_v19 = vld [vmem:[%s6670_s3 + $0x4c] ss:$16 sps:$4 sm:$0xff]   ;;  %v4779_v48 = vld [vmem:[%s6670_s3 + $0x40] ss:$16 sps:$4 sm:$0xff]  }
 0x622   : > { %v4782_v20 = vld [vmem:[%s6670_s3 + $0x48] ss:$16 sps:$4 sm:$0xff]   ;;  %v4824_v9 = vld [vmem:[%s5895_s22 + $0xd0] sm:$0xff]  }
 0x623   : > { %v2927_v28 = vcombine.low %v2908_v27, %v2924_v24  ;;  %v2926_v29 = vcombine.high %v2901_v25, %v2917_v45  ;;  %v2925_v30 = vcombine.low %v2901_v25, %v2917_v45  ;;  %v2928_v31 = vcombine.high %v2908_v27, %v2924_v24  ;;  %v4791_v27 = vld [vmem:[%s6670_s3 + $0x80] ss:$16 sps:$4 sm:$0xff]   ;;  %v4793_v24 = vld [vmem:[%s6670_s3 + $0x84] ss:$16 sps:$4 sm:$0xff]   ;;  %v4794_v25 = vld [vmem:[%s6670_s3 + $0x88] ss:$16 sps:$4 sm:$0xff]  }
 0x624   : > { %3335 = vmatpush1.bf16.msra.mxu1 %v4773_v11  ;;  %v4796_v45 = vld [vmem:[%s6670_s3 + $0x8c] ss:$16 sps:$4 sm:$0xff]   ;;  %v4826_v11 = vld [vmem:[%s5895_s22 + $0x90] sm:$0xff]  }
 0x625   : > { %v4725_v40 = vpack.i.bf16 %v2927_v28, %v2859_v21  ;;  %v4720_v3 = vpack.i.bf16 %v2926_v29, %v2858_v23  ;;  %v4730_v32 = vpack.i.bf16 %v2928_v31, %v2860_v54  ;;  %3336 = vmatprep.subr.bf16.mxu1 %v4781_v39  ;;  %v4787_v21 = vld [vmem:[%s6670_s3 + $0x64] ss:$16 sps:$4 sm:$0xff]   ;;  %v4785_v23 = vld [vmem:[%s6670_s3 + $0x60] ss:$16 sps:$4 sm:$0xff]   ;;  %v4788_v54 = vld [vmem:[%s6670_s3 + $0x68] ss:$16 sps:$4 sm:$0xff]  }
 0x626   : > { %v4802_v28 = vld [vmem:[%s6670_s3 + $0xac] ss:$16 sps:$4 sm:$0xff]   ;;  %v4797_v29 = vld [vmem:[%s6670_s3 + $0xa0] ss:$16 sps:$4 sm:$0xff]   ;;  %v4805_v31 = vld [vmem:[%s6670_s3 + $0xc4] ss:$16 sps:$4 sm:$0xff]  }
 0x627   : > { %4726 = vrot.lane.b32.xlu0 %v4725_v40, %s5274_s8  ;;  %4721 = vrot.lane.b32.xlu1 %v4720_v3, %s5276_s9  ;;  %v4808_v40 = vld [vmem:[%s6670_s3 + $0xcc] ss:$16 sps:$4 sm:$0xff]   ;;  %v5279_v3 = vmov 0   ;;  %s6680_s9 = sld [smem:[#allocation22_spill]] }
 0x628   : > { %3337 = vmatpush1.bf16.msra.mxu1 %v4779_v48  ;;  %3364 = vmatprep.mubr.bf16.mxu1 %v5279_v3  ;;  %v4821_v2 = vld [vmem:[%s5895_s22 + $0x8] sm:$0xff]  }
 0x629   : > { %3338 = vmatprep.subr.bf16.mxu1 %v4787_v21  ;;  %v4836_v39 = vld [vmem:[%s5895_s22 + $0xe8] sm:$0xff]   ;;  %v4840_v21 = vld [vmem:[%s5895_s22 + $0xf0] sm:$0xff]  }
 0x62a   : > { %v4838_v48 = vld [vmem:[%s5895_s22 + $0xa8] sm:$0xff]  }
 0x62b   : > { %4731 = vrot.lane.b32.xlu1 %v4730_v32, %s5275_s2  ;;  %v4803_v32 = vld [vmem:[%s6670_s3 + $0xc0] ss:$16 sps:$4 sm:$0xff]   ;;  %s4313_s2 = sshll.u32 %s6678_s17, 2 }
 0x62c   : > { %3339 = vmatpush1.bf16.msra.mxu1 %v4785_v23  ;;  %v4842_v23 = vld [vmem:[%s5895_s22 + $0xb0] sm:$0xff]  }
 0x62d   : > { %3340 = vmatprep.subr.bf16.mxu1 %v4793_v24  ;;  %v4845_v24 = vld [vmem:[%s5895_s22 + $0x38] sm:$0xff]  }
 0x630   : > { %3341 = vmatpush1.bf16.msra.mxu1 %v4791_v27  ;;  %v4844_v27 = vld [vmem:[%s5895_s22 + $0xf8] sm:$0xff]  }
 0x631   : > { %3342 = vmatprep.subr.bf16.mxu1 %v4799_v26  ;;  %v3162_v26 = vsub.s32 2, %v5996_v50 }
 0x634   : > { %3343 = vmatpush1.bf16.msra.mxu1 %v4797_v29  ;;  %v3158_v29 = vsub.s32 1, %v5996_v50 }
 0x635   : > { %3344 = vmatprep.subr.bf16.mxu1 %v4805_v31 }
 0x638   : > { %3345 = vmatpush1.bf16.msra.mxu1 %v4803_v32 }
 0x699   : > { %v4727_v33 = vpop.permute.xlu0 %4726  ;;  %v4722_v34 = vpop.permute.xlu1 %4721 }
 0x69a   : > { %v4724_v35 = vunpack.i.h.bf16 %v4722_v34  ;;  %v4723_v36 = vunpack.i.l.bf16 %v4722_v34  ;;  %v4729_v61 = vunpack.i.h.bf16 %v4727_v33  ;;  %v4728_v41 = vunpack.i.l.bf16 %v4727_v33  ;;  %v4806_v33 = vld [vmem:[%s6670_s3 + $0xc8] ss:$16 sps:$4 sm:$0xff]   ;;  %v4811_v34 = vld [vmem:[%s6670_s3 + $0xe4] ss:$16 sps:$4 sm:$0xff]  }
 0x69b   : > { %3346 = vmatprep.subr.bf16.mxu1 %v4811_v34 }
 0x69c   : > { %v2953_v42 = vsel %vm2191_vm1, %v2857_v22, %v4723_v36  ;;  %v2954_v43 = vsel %vm2191_vm1, %v2925_v30, %v4724_v35  ;;  %v4790_v22 = vld [vmem:[%s6670_s3 + $0x6c] ss:$16 sps:$4 sm:$0xff]   ;;  %v4800_v30 = vld [vmem:[%s6670_s3 + $0xa8] ss:$16 sps:$4 sm:$0xff]   ;;  %v4809_v36 = vld [vmem:[%s6670_s3 + $0xe0] ss:$16 sps:$4 sm:$0xff]  }
 0x69d   : > { %v4732_v44 = vpop.permute.xlu1 %4731  ;;  %v2956_v49 = vsel %vm2955_vm3, %v2953_v42, %v4728_v41  ;;  %v2957_v51 = vsel %vm2955_vm3, %v2954_v43, %v4729_v61  ;;  %v4814_v35 = vld [vmem:[%s6670_s3 + $0xec] ss:$16 sps:$4 sm:$0xff]   ;;  %v4812_v61 = vld [vmem:[%s6670_s3 + $0xe8] ss:$16 sps:$4 sm:$0xff]   ;;  %v4815_v41 = vld [vmem:[%s5895_s22 + $0x40] sm:$0xff]   ;;  %3347 = vmatpush1.bf16.msra.mxu1 %v4809_v36  ;;  %s6682_s3 = sld [smem:[#allocation42_spill]] }
 0x69e   : > { %v4734_v46 = vunpack.i.h.bf16 %v4732_v44  ;;  %v4733_v47 = vunpack.i.l.bf16 %v4732_v44  ;;  %v4816_v42 = vld [vmem:[%s5895_s22 + $0xc0] sm:$0xff]   ;;  %4376 = vmatprep.subr.bf16.mxu1 %v4815_v41 }
 0x6a0   : > { %v2959_v53 = vsel %vm2958_vm4, %v2956_v49, %v4733_v47  ;;  %v2960_v56 = vsel %vm2958_vm4, %v2957_v51, %v4734_v46 }
 0x6a1   : > { %v2961_v52 = vpack.c.bf16 %v2960_v56, %v2959_v53  ;;  %v4242_v56 = vld [vmem:[%s6674_s7] ss:$0 sm:$0xff]  ;;  %s5280_s7 = smov [#allocation15]  }
 0x6a2   : > { %s5103_s5 = sshll.u32 %s5280_s7, 4  ;;  %s5104_s5 = int_to_ptr.vmem [resolvable:$false] %s5103_s5 }
 0x6a3   : > { %4545 = vmatmul.mubr.bf16.vlgmr.msra.gmra.mrb[8].mxu0 %v2961_v52  ;;  %p6686_p11 = scmp.ne.s32.totalorder %s6682_s3, 0  ;;  %s5105_s4 = scalar_lea.vmem %s5104_s5, 512 }
 0x6a4   : > { %3376 = vmatpush1.bf16.msra.mxu0 %v4770_v58  ;;  %3407 = vmatprep.mubr.bf16.mxu0 %v5279_v3  ;;  %v4822_v58 = vld [vmem:[%s5895_s22 + $0x88] sm:$0xff]   ;;  %p5106_p7 = scmp.lt.s32.totalorder %s6414_s0, %s5104_s5  ;;  %p5107_p6 = scmp.lt.s32.totalorder %s5105_s4, %s5099_s27 }
 0x6a5   : > { %3377 = vmatprep.subr.bf16.mxu0 %v4778_v10  ;;  %v4825_v10 = vld [vmem:[%s5895_s22 + $0x10] sm:$0xff]   ;;  %p5101_p12 = pnand %p5100_p10, %p6686_p11 }
 0x6a6   : > { %p5108_p0 = por %p5107_p6, %p5106_p7 }
 0x6a7   : > { %p5102_p4 = pneg %p5101_p12 }
 0x6a8   : > { %3378 = vmatpush1.bf16.msra.mxu0 %v4776_v12  ;;  %v4827_v12 = vld [vmem:[%s5895_s22 + $0x58] sm:$0xff]  }
 0x6a9   : > { %3379 = vmatprep.subr.bf16.mxu0 %v4784_v19  ;;  %v4837_v19 = vld [vmem:[%s5895_s22 + $0x28] sm:$0xff]   ;;  %p5109_p1 = pnand %p5108_p0, %p5102_p4 }
 0x6ac   : > { %3380 = vmatpush1.bf16.msra.mxu0 %v4782_v20  ;;  %v4839_v20 = vld [vmem:[%s5895_s22 + $0x70] sm:$0xff]  }
 0x6ad   : > { %3381 = vmatprep.subr.bf16.mxu0 %v4790_v22  ;;  %v4841_v22 = vld [vmem:[%s5895_s22 + $0x30] sm:$0xff]  }
 0x6b0   : > { %3382 = vmatpush1.bf16.msra.mxu0 %v4788_v54  ;;  %v4843_v54 = vld [vmem:[%s5895_s22 + $0x78] sm:$0xff]  }
 0x6b1   : > { %3383 = vmatprep.subr.bf16.mxu0 %v4796_v45  ;;  %v3154_v45 = vsub.s32 0, %v5996_v50 }
 0x6b4   : > { %3384 = vmatpush1.bf16.msra.mxu0 %v4794_v25  ;;  %v4846_v25 = vld [vmem:[%s5895_s22 + $0xb8] sm:$0xff]  }
 0x6b5   : > { %3385 = vmatprep.subr.bf16.mxu0 %v4802_v28  ;;  %v3150_v28 = vld [vmem:[%s5885_s15] sm:$0xf] }
 0x6b6   : > { %v3155_v31 = vrot.slane %v3150_v28, %v3154_v45  ;;  %v3159_v3 = vrot.slane %v3150_v28, %v3158_v29 }
 0x6b8   : > { %3386 = vmatpush1.bf16.msra.mxu0 %v4800_v30  ;;  %v3166_v30 = vsub.s32 3, %v5996_v50 }
 0x6b9   : > { %3387 = vmatprep.subr.bf16.mxu0 %v4808_v40  ;;  %v3163_v40 = vrot.slane %v3150_v28, %v3162_v26 }
 0x6ba   : > { %v3167_v32 = vrot.slane %v3150_v28, %v3166_v30 }
 0x6bc   : > { %3388 = vmatpush1.bf16.msra.mxu0 %v4806_v33 }
 0x6bd   : > { %3389 = vmatprep.subr.bf16.mxu0 %v4814_v35 }
 0x6c0   : > { %3390 = vmatpush1.bf16.msra.mxu0 %v4812_v61 }
 0x6c1   : > { %4398 = vmatprep.subr.bf16.mxu0 %v4816_v42 }
 0x776   : > { %v3067_v57 = vpop.f32.mrb[8].mxu0 }
 0x777   : > { %v3068_v59 = vadd.f32 %v4233_v55, %v3067_v57  ;;  %v4546_v62 = vpop.f32.mrb[9].mxu0 }
 0x778   : > { %v3070_v63 = vpop.f32.mrb[10].mxu0  ;;  %v4243_v62 = vld [vmem:[%s941_s11] ss:$0 sm:$0xff] }
 0x779   : > { %v3071_v1 = vadd.f32 %v4233_v55, %v3070_v63  ;;  %v4547_v60 = vpop.f32.mrb[11].mxu0  ;;  %v3074_v0 = vadd.f32 %v4887_v4, %v3068_v59  ;;  %v4817_v4 = vld [vmem:[%s5895_s22] sm:$0xff]  }
 0x77b   : > { %3078 = vadd.xlane.f32.xlu1 %v3074_v0  ;;  %v3075_v6 = vadd.f32 %v4888_v5, %v3071_v1 }
 0x77d   : > { %3080 = vadd.xlane.f32.xlu0 %v3075_v6 }
 0x808   : > { %v3079_v13 = vpop.xlane.xlu1 %3078 }
 0x809   : > { %v3083_v14 = vmul.f32 0.0078125, %v3079_v13  ;;  %v4828_v13 = vld [vmem:[%s5895_s22 + $0xd8] sm:$0xff]  }
 0x80a   : > { %v3081_v15 = vpop.xlane.xlu0 %3080 }
 0x80b   : > { %v6307_v16 = vsub.f32 %v3074_v0, %v3083_v14  ;;  %v3084_v17 = vmul.f32 0.0078125, %v3081_v15  ;;  %v4818_v0 = vld [vmem:[%s5895_s22 + $0x80] sm:$0xff]   ;;  %v4829_v14 = vld [vmem:[%s5895_s22 + $0x18] sm:$0xff]  }
 0x80c   : > { %v4830_v15 = vld [vmem:[%s5895_s22 + $0x98] sm:$0xff]  }
 0x80d   : > { %v6309_v18 = vsub.f32 %v3075_v6, %v3084_v17  ;;  %v3087_v37 = vmul.f32 %v6307_v16, %v6307_v16  ;;  %v4819_v6 = vld [vmem:[%s5895_s22 + $0x48] sm:$0xff]   ;;  %v4832_v17 = vld [vmem:[%s5895_s22 + $0xe0] sm:$0xff]  }
 0x80f   : > { %3089 = vadd.xlane.f32.xlu0 %v3087_v37  ;;  %v3088_v38 = vmul.f32 %v6309_v18, %v6309_v18  ;;  %v4834_v37 = vld [vmem:[%s5895_s22 + $0xa0] sm:$0xff]  }
 0x811   : > { %3091 = vadd.xlane.f32.xlu1 %v3088_v38  ;;  %v4835_v38 = vld [vmem:[%s5895_s22 + $0x68] sm:$0xff]  }
 0x89c   : > { %v3090_v43 = vpop.xlane.xlu0 %3089 }
 0x89d   : > { %v3093_v44 = vmul.f32 0.0078125, %v3090_v43 }
 0x89e   : > { %v3092_v46 = vpop.xlane.xlu1 %3091 }
 0x89f   : > { %v3095_v47 = vadd.f32 1e-05, %v3093_v44  ;;  %v3094_v49 = vmul.f32 0.0078125, %v3092_v46 }
 0x8a1   : > { %4879 = vrsqrt.f32 %v3095_v47  ;;  %v3096_v51 = vadd.f32 1e-05, %v3094_v49 }
 0x8a3   : > { %4881 = vrsqrt.f32 %v3096_v51 }
 0x8ab   : > { %v4880_v53 = vpop.eup %4879 }
 0x8ac   : > { %v3099_v52 = vmul.f32 %v4880_v53, %v6307_v16  ;;  %v4831_v16 = vld [vmem:[%s5895_s22 + $0x60] sm:$0xff]  }
 0x8ad   : > { %v4882_v55 = vpop.eup %4881 }
 0x8ae   : > { %v3100_v57 = vmul.f32 %v4882_v55, %v6309_v18  ;;  %v3107_v59 = vmul.f32 %v4242_v56, %v3099_v52  ;;  %v4833_v18 = vld [vmem:[%s5895_s22 + $0x20] sm:$0xff]  }
 0x8b0   : > { %v3108_v63 = vmul.f32 %v4242_v56, %v3100_v57  ;;  %v6353_v1 = vadd.f32 %v4243_v62, %v3107_v59 }
 0x8b2   : > { %v6355_v60 = vadd.f32 %v4243_v62, %v3108_v63 }
 0x8b4   : > { %v3117_v5 = vpack.c.bf16 %v6355_v60, %v6353_v1 }
 0x8b6   : > { %3365 = vmatmul.mubr.bf16.vlgmr.msra.gmra.mrb[36].mxu1 %v3117_v5  ;;  %3408 = vmatmul.mubr.bf16.vlgmr.msra.gmra.mrb[12].mxu0 %v3117_v5 }
 0x8b7   : > { %4377 = vmatpush3.bf16.msra.mxu1 %v4817_v4  ;;  %4399 = vmatpush3.bf16.msra.mxu0 %v4818_v0 }
 0x8b8   : > { %4378 = vmatprep.subr.bf16.mxu1 %v4819_v6  ;;  %4400 = vmatprep.subr.bf16.mxu0 %v4820_v7 }
 0x8bb   : > { %4379 = vmatpush3.bf16.msra.mxu1 %v4821_v2  ;;  %4401 = vmatpush3.bf16.msra.mxu0 %v4822_v58 }
 0x8bc   : > { %4380 = vmatprep.subr.bf16.mxu1 %v4823_v8  ;;  %4402 = vmatprep.subr.bf16.mxu0 %v4824_v9  ;;  %v4276_v9 = vld [vmem:[%s948_s29] ss:$0 sm:$0xff]  ;;  %s6677_s29 = sld [smem:[#allocation28_spill]] }
 0x8bf   : > { %4381 = vmatpush3.bf16.msra.mxu1 %v4825_v10  ;;  %4403 = vmatpush3.bf16.msra.mxu0 %v4826_v11 }
 0x8c0   : > { %4382 = vmatprep.subr.bf16.mxu1 %v4827_v12  ;;  %4404 = vmatprep.subr.bf16.mxu0 %v4828_v13 }
 0x8c2   : > { %s4312_s8 = sshll.u32 %s6677_s29, 1 }
 0x8c3   : > { %4383 = vmatpush3.bf16.msra.mxu1 %v4829_v14  ;;  %4405 = vmatpush3.bf16.msra.mxu0 %v4830_v15  ;;  %s3834_s1 = sadd.s32 %s4313_s2, %s4312_s8 }
 0x8c4   : > { %4384 = vmatprep.subr.bf16.mxu1 %v4831_v16  ;;  %4406 = vmatprep.subr.bf16.mxu0 %v4832_v17  ;;  %s4314_s6 = sshll.u32 %s3834_s1, 7 }
 0x8c5   : > { %s6420_s10 = scalar_lea.hbm %s6683_s26, %s4314_s6 }
 0x8c7   : > { %4385 = vmatpush3.bf16.msra.mxu1 %v4833_v18  ;;  %4407 = vmatpush3.bf16.msra.mxu0 %v4834_v37 }
 0x8c8   : > { %4386 = vmatprep.subr.bf16.mxu1 %v4835_v38  ;;  %4408 = vmatprep.subr.bf16.mxu0 %v4836_v39 }
 0x8cb   : > { %4387 = vmatpush3.bf16.msra.mxu1 %v4837_v19  ;;  %4409 = vmatpush3.bf16.msra.mxu0 %v4838_v48 }
 0x8cc   : > { %4388 = vmatprep.subr.bf16.mxu1 %v4839_v20  ;;  %4410 = vmatprep.subr.bf16.mxu0 %v4840_v21 }
 0x8cf   : > { %4389 = vmatpush3.bf16.msra.mxu1 %v4841_v22  ;;  %4411 = vmatpush3.bf16.msra.mxu0 %v4842_v23 }
 0x8d0   : > { %4390 = vmatprep.subr.bf16.mxu1 %v4843_v54  ;;  %4412 = vmatprep.subr.bf16.mxu0 %v4844_v27 }
 0x8d3   : > { %4391 = vmatpush3.bf16.msra.mxu1 %v4845_v24  ;;  %4413 = vmatpush3.bf16.msra.mxu0 %v4846_v25 }
 0x989   : > { %v3366_v33 = vpop.f32.mrb[36].mxu1  ;;  %v3409_v34 = vpop.f32.mrb[12].mxu0 }
 0x98a   : > { %v3367_v35 = vadd.f32 %v3366_v33, %v3155_v31  ;;  %v3410_v36 = vadd.f32 %v3409_v34, %v3163_v40  ;;  %v3368_v61 = vpop.f32.mrb[37].mxu1  ;;  %v3411_v41 = vpop.f32.mrb[13].mxu0  ;;  %v4310_v34 = vld [vmem:[%s954_s24] ss:$0 sm:$0xff]  ;;  %s6685_s24 = sand.u32 1, %s6680_s9  }
 0x98b   : > { %v3369_v42 = vadd.f32 %v3368_v61, %v3159_v3  ;;  %v3412_v43 = vadd.f32 %v3411_v41, %v3167_v32  ;;  %v3370_v44 = vpop.f32.mrb[38].mxu1  ;;  %v3413_v46 = vpop.f32.mrb[14].mxu0  ;;  %s6425_s28 = scalar_lea.sflag [#allocation5], %s6685_s24 }
 0x98c   : > { %v3371_v47 = vadd.f32 %v3370_v44, %v3155_v31  ;;  %v3414_v49 = vadd.f32 %v3413_v46, %v3163_v40  ;;  %v3372_v51 = vpop.f32.mrb[39].mxu1  ;;  %v3415_v53 = vpop.f32.mrb[15].mxu0  ;;  %v3418_v52 = vmax.f32 %v3367_v35, 0.0  ;;  %v3420_v55 = vmax.f32 %v3410_v36, 0.0 }
 0x98d   : > { %v3373_v56 = vadd.f32 %v3372_v51, %v3159_v3  ;;  %v3416_v50 = vadd.f32 %v3415_v53, %v3167_v32  ;;  %v3419_v62 = vmax.f32 %v3369_v42, 0.0  ;;  %v3421_v63 = vmax.f32 %v3412_v43, 0.0  ;;  %v4309_v3 = vld [vmem:[%s951_s30] ss:$0 sm:$0xff] }
 0x98e   : > { %v3422_v57 = vmax.f32 %v3371_v47, 0.0  ;;  %v3424_v59 = vmax.f32 %v3414_v49, 0.0 }
 0x98f   : > { %v3423_v4 = vmax.f32 %v3373_v56, 0.0  ;;  %v3425_v0 = vmax.f32 %v3416_v50, 0.0 }
 0x990   : > { %v3426_v5 = vpack.c.bf16 %v3422_v57, %v3418_v52  ;;  %v3428_v6 = vpack.c.bf16 %v3424_v59, %v3420_v55 }
 0x991   : > { %v3427_v7 = vpack.c.bf16 %v3423_v4, %v3419_v62  ;;  %v3429_v2 = vpack.c.bf16 %v3425_v0, %v3421_v63 }
 0x993   : > { %3725 = vmatprep.mubr.bf16.mxu1 %v3427_v7  ;;  %3766 = vmatprep.mubr.bf16.mxu0 %v3429_v2 }
 0x994   : > { %3726 = vmatmul.mubr.bf16.vlgmr.msra.gmra.mrb[40].mxu1 %v3426_v5  ;;  %3767 = vmatmul.mubr.bf16.vlgmr.msra.gmra.mrb[16].mxu0 %v3428_v6 }
 0xa67   : > { %v4392_v58 = vpop.f32.mrb[40].mxu1  ;;  %v4414_v8 = vpop.f32.mrb[16].mxu0 }
 0xa68   : > { %v4393_v10 = vpop.f32.mrb[41].mxu1  ;;  %v4415_v11 = vpop.f32.mrb[17].mxu0 }
 0xa69   : > { %v4394_v12 = vadd.f32 %v4393_v10, %v4392_v58  ;;  %v4416_v13 = vadd.f32 %v4415_v11, %v4414_v8  ;;  %v4395_v14 = vpop.f32.mrb[42].mxu1  ;;  %v4417_v15 = vpop.f32.mrb[18].mxu0 }
 0xa6a   : > { %v4396_v16 = vpop.f32.mrb[43].mxu1  ;;  %v4418_v17 = vpop.f32.mrb[19].mxu0 }
 0xa6b   : > { %v3728_v18 = vadd.f32 %v4394_v12, %v4276_v9  ;;  %v4397_v37 = vadd.f32 %v4396_v16, %v4395_v14  ;;  %v4419_v38 = vadd.f32 %v4418_v17, %v4417_v15 }
 0xa6d   : > { %v3769_v39 = vadd.f32 %v4416_v13, %v3728_v18  ;;  %v3731_v19 = vadd.f32 %v4397_v37, %v4276_v9 }
 0xa6f   : > { %v3772_v48 = vadd.f32 %v4419_v38, %v3731_v19  ;;  %v3775_v20 = vadd.f32 %v3769_v39, %v6353_v1 }
 0xa71   : > { %3779 = vadd.xlane.f32.xlu0 %v3775_v20  ;;  %v3776_v21 = vadd.f32 %v3772_v48, %v6355_v60 }
 0xa73   : > { %3781 = vadd.xlane.f32.xlu1 %v3776_v21 }
 0xafe   : > { %v3780_v22 = vpop.xlane.xlu0 %3779 }
 0xaff   : > { %v3783_v23 = vmul.f32 0.0078125, %v3780_v22 }
 0xb00   : > { %v3782_v54 = vpop.xlane.xlu1 %3781 }
 0xb01   : > { %v3785_v27 = vsub.f32 %v3775_v20, %v3783_v23  ;;  %v3784_v24 = vmul.f32 0.0078125, %v3782_v54 }
 0xb03   : > { %v3786_v25 = vsub.f32 %v3776_v21, %v3784_v24  ;;  %v3787_v45 = vmul.f32 %v3785_v27, %v3785_v27 }
 0xb05   : > { %3789 = vadd.xlane.f32.xlu0 %v3787_v45  ;;  %v3788_v26 = vmul.f32 %v3786_v25, %v3786_v25 }
 0xb07   : > { %3791 = vadd.xlane.f32.xlu1 %v3788_v26 }
 0xb92   : > { %v3790_v28 = vpop.xlane.xlu0 %3789 }
 0xb93   : > { %v3793_v1 = vmul.f32 0.0078125, %v3790_v28 }
 0xb94   : > { %v3792_v29 = vpop.xlane.xlu1 %3791 }
 0xb95   : > { %v3795_v60 = vadd.f32 1e-05, %v3793_v1  ;;  %v3794_v30 = vmul.f32 0.0078125, %v3792_v29 }
 0xb97   : > { %4883 = vrsqrt.f32 %v3795_v60  ;;  %v3796_v31 = vadd.f32 1e-05, %v3794_v30 }
 0xb99   : > { %4885 = vrsqrt.f32 %v3796_v31 }
 0xba1   : > { %v4884_v40 = vpop.eup %4883 }
 0xba2   : > { %v3799_v32 = vmul.f32 %v4884_v40, %v3785_v27 }
 0xba3   : > { %v4886_v33 = vpop.eup %4885 }
 0xba4   : > { %v3807_v35 = vmul.f32 %v4309_v3, %v3799_v32  ;;  %v3800_v36 = vmul.f32 %v4886_v33, %v3786_v25 }
 0xba6   : > { %v3808_v61 = vmul.f32 %v4309_v3, %v3800_v36  ;;  %v3815_v41 = vadd.f32 %v4310_v34, %v3807_v35 }
 0xba8   : > { %v3816_v42 = vadd.f32 %v4310_v34, %v3808_v61  ;;  %3817 = vst [vmem:[#allocation2] sm:$0xff] %v3815_v41  ;;  %3819 = vst [vmem:[%s5897_s25] sm:$0xff] %v3815_v41 }
 0xbaa   : > { %3818 = vst [vmem:[#allocation2 + $0x8] sm:$0xff] %v3816_v42  ;;  %3820 = vst [vmem:[%s5897_s25 + $0x8] sm:$0xff] %v3816_v42 }
 0xbab   : > { %5112 = shalt.err (!%p5109_p1)
}
 0xbac   : > { %s5113_s25 = scalar_lea.hbm %s6420_s10, 256  ;;  %s5117_s15 = scalar_lea.hbm %s6684_s14, 1024 }
 0xbad   : > { %p5114_p13 = scmp.ne.s32.totalorder %s6420_s10, %s5113_s25  ;;  %p5118_p9 = scmp.lt.u32.totalorder %s6420_s10, %s6684_s14 }
 0xbae   : > { %p5119_p5 = scmp.lt.u32.totalorder %s5117_s15, %s5113_s25  ;;  %p5121_p10 = scmp.lt.u32.totalorder %s5113_s25, %s6420_s10 }
 0xbaf   : > { %p5115_p8 = pnand %p5114_p13, %p6686_p11 }
 0xbb0   : > { %p5120_p3 = por %p5119_p5, %p5118_p9 }
 0xbb1   : > { %p5116_p2 = pneg %p5115_p8 }
 0xbb2   : > { %p5122_p12 = por %p5121_p10, %p5120_p3 }
 0xbb4   : > { %p5123_p4 = pnand %p5122_p12, %p5116_p2 }
 0xbb6   : > { %5126 = shalt.err (!%p5123_p4)
}
 0xbb7   : > { %s5281_s17 = smov 128   ;;  %s5282_s8 = smov 8  }
 0xbb8   : > { %4562 = dma.vmem_to_hbm [thread:$0]  (%p6686_p11), %s6414_s0, 256, %s6420_s10, %s6425_s28, %s5281_s17, %s5281_s17, %s5282_s8  }
 0xbb9 PF: > { %s6687_s2 = sld [smem:[#allocation32_spill]]  ;;  %s6688_s23 = sld [smem:[#allocation21_spill]] }
 0xbba   : > { %s6689_s16 = sld [smem:[#allocation43_spill]] }
 0xbbf   : > { %p4591_p7 = scmp.ge.s32.totalorder %s6687_s2, 2  ;;  %s3852_s12 = sand.u32 1, %s6688_s23  }
 0xbc0   : > { %p6690_p6 = scmp.ne.s32.totalorder %s6689_s16, 0  ;;  %s3853_s1 = scalar_lea.sflag [#allocation5], %s3852_s12 }
 0xbc2   : > { %p4587_p0 = pnand %p4591_p7, %p6690_p6 }
 0xbc4   : > { %5200 = dma.done.wait (!%p4587_p0), %s3853_s1, 256  }
 0xbc5   : > { %5202 = vsyncadd (!%p4587_p0), %s3853_s1, 4294967040  ;;  %s42_s22 = sadd.s32 1, %s6687_s2   ;;  %s6692_s24 = sld [smem:[#allocation22_spill]] }
 0xbc6   : > { %p6454_p1 = scmp.ge.s32.totalorder %s42_s22, 6   ;;  %s6693_s25 = sld [smem:[#allocation23_spill]] }
 0xbc7   : > { %s6694_s26 = sld [smem:[#allocation41_spill]]  ;;  %s6695_s27 = sld [smem:[#allocation24_spill]] }
 0xbc8   : > { %s6696_s28 = sld [smem:[#allocation25_spill]]  ;;  %s6697_s29 = sld [smem:[#allocation39_spill]] }
 0xbc9   : > { %s6698_s0 = sld [smem:[#allocation26_spill]]  ;;  %s6699_s30 = sld [smem:[#allocation27_spill]] }
 0xbca   : > { %s6700_s18 = sld [smem:[#allocation40_spill]]  ;;  %s6701_s19 = sld [smem:[#allocation30_spill]] }
 0xbcb   : > { %s6702_s1 = sld [smem:[#allocation31_spill]]  ;;  %s6703_s20 = sld [smem:[#allocation36_spill]] }
 0xbcc   : > { %s6704_s21 = sld [smem:[#allocation37_spill]]  ;;  %41 = sbr.rel (!%p6454_p1) target bundleno = 35 (0x23), region = 239 }
 0xbd3   :  { %3858 = vsyncpa [#allocation4], 1 }
 0xbd4   :  { %3860 = vsyncpa [#allocation4 + $0x1], 1 }
 0xbd5   :  { %3861 = vsyncpa [#allocation7], 1 }
 0xbd6   :  { %3863 = vsyncpa [#allocation7 + $0x1], 1 }
 0xbd7   :  { %3864 = vsyncpa [#allocation10], 1 }
 0xbd8   :  { %3866 = vsyncpa [#allocation10 + $0x1], 1 }
 0xbd9   :  { %3867 = vsyncpa [#allocation13], 1 }
 0xbda   :  { %3869 = vsyncpa [#allocation13 + $0x1], 1 }
 0xbdb   :  { %3870 = vsyncpa [#allocation5], 1 }
 0xbdc   :  { %3872 = vsyncpa [#allocation5 + $0x1], 1 }

</bundles_post_ra>
